<compile_context>
chip_gen: v7x
topology: tpu7x:2x2x1
jax: 0.10.0
libtpu: 0.0.40
codegen_flags: <defaults>
</compile_context>

<pallas_src>
import functools

import jax
import jax.numpy as jnp
from jax import lax
from jax.experimental import pallas as pl
from jax.experimental.pallas import tpu as pltpu


def _round_up(x, m):
    return ((x + m - 1) // m) * m


def _pick_tile_rows(H, W, target_rows):
    """Largest divisor TH of H with TH*W a multiple of 8 and <= target_rows."""
    cands = [th for th in range(1, H + 1) if H % th == 0 and (th * W) % 8 == 0]
    if not cands:
        return H
    fitting = [th for th in cands if th * W <= target_rows]
    return max(fitting) if fitting else min(cands)


def _bottleneck_kernel(x_ref, xh_ref, w1_ref, b1_ref, w2_ref, b2_ref,
                       nf_ref, nl_ref, o_ref, y1pad_ref, *, W, P, add):
    """Fused cv1(1x1) + cv2(3x3, pad=1), folded BN, ReLU6, optional residual.

    x_ref:     (1, M_t, C1p)     bf16  one row-tile, flattened row-major (h, w)
    xh_ref:    (1, 2*W, C1p)     bf16  image row above / below the tile
    w1_ref:    (C1p, C_p)        bf16  BN1 scale folded in
    b1_ref:    (1, C_p)          f32   BN1 bias
    w2_ref:    (9, C_p, C2p)     bf16  tap-major (t = 3*dy + dx), BN2 folded
    b2_ref:    (1, C2p)          f32   BN2 bias
    nf_ref:    (M_t, 1)          f32   1.0 where w != 0     (left-col validity)
    nl_ref:    (M_t, 1)          f32   1.0 where w != W-1   (right-col validity)
    o_ref:     (1, M_t, C2p)     bf16
    y1pad_ref: (P + M_t + W + 1, C_p) bf16 halo scratch (main rows at offset P)
    """
    M_t = x_ref.shape[1]
    C_p = y1pad_ref.shape[1]
    r = pl.program_id(1)
    nr = pl.num_programs(1)

    x2d = x_ref[0]        # (M_t, C1p) bf16
    xh = xh_ref[0]        # (2*W, C1p) bf16
    w1 = w1_ref[...]
    b1 = b1_ref[...]

    # ---- cv1 on the tile rows: 1x1 conv == channel matmul + bias + ReLU6.
    y1 = jnp.dot(x2d, w1, preferred_element_type=jnp.float32)
    y1 = jnp.clip(y1 + b1, 0.0, 6.0).astype(jnp.bfloat16)

    # ---- cv1 on the two halo rows; zero them at the image top/bottom (SAME
    #      padding of cv2 pads y1 with zeros, NOT with cv1(0)).
    y1h = jnp.dot(xh, w1, preferred_element_type=jnp.float32)
    y1h = jnp.clip(y1h + b1, 0.0, 6.0)
    top_ok = (r > 0).astype(jnp.float32)
    bot_ok = (r < nr - 1).astype(jnp.float32)
    y1_top = (y1h[:W] * top_ok).astype(jnp.bfloat16)
    y1_bot = (y1h[W:] * bot_ok).astype(jnp.bfloat16)

    # ---- stage into the halo scratch (only the 2 corner-guard rows are zeroed;
    #      everything else is fully overwritten each step).
    zrow = jnp.zeros((1, C_p), jnp.bfloat16)
    y1pad_ref[pl.ds(P - W - 1, 1), :] = zrow
    y1pad_ref[pl.ds(P + M_t + W, 1), :] = zrow
    y1pad_ref[pl.ds(P - W, W), :] = y1_top
    y1pad_ref[pl.ds(P, M_t), :] = y1          # P is a multiple of 8 -> aligned
    y1pad_ref[pl.ds(P + M_t, W), :] = y1_bot

    # ---- cv2: 3x3 conv as 9 shifted matmuls accumulated in f32 (no im2col).
    #      Taps are grouped by stencil column so the left/right edge masks are
    #      applied once per group after the matmul (mask commutes row-wise).
    def tap(dy, dx):
        return y1pad_ref[pl.ds(P - W - 1 + dy * W + dx, M_t), :]

    def col_acc(dx):
        a = jnp.dot(tap(0, dx), w2_ref[dx], preferred_element_type=jnp.float32)
        a = a + jnp.dot(tap(1, dx), w2_ref[3 + dx],
                        preferred_element_type=jnp.float32)
        a = a + jnp.dot(tap(2, dx), w2_ref[6 + dx],
                        preferred_element_type=jnp.float32)
        return a

    acc = col_acc(1)                       # center column, no mask needed
    acc = acc + nf_ref[...] * col_acc(0)   # left column  (zero where w == 0)
    acc = acc + nl_ref[...] * col_acc(2)   # right column (zero where w == W-1)

    y2 = jnp.clip(acc + b2_ref[...], 0.0, 6.0)
    if add:
        y2 = y2 + x2d.astype(jnp.float32)  # residual (C1p == C2p when add)
    o_ref[0] = y2.astype(o_ref.dtype)


def bottleneck_forward(x_nchw, params, *, shortcut=True, block_rows=1024):
    """Pallas implementation of Bottleneck.forward (NCHW in / NCHW out)."""
    w1, s1, b1, w2, s2, b2 = params
    N, C1, H, W = x_nchw.shape
    C_ = w1.shape[1]
    C2 = w2.shape[-1]
    add = shortcut and (C1 == C2)
    M = H * W

    f32, bf16 = jnp.float32, jnp.bfloat16

    # Lane-dense channel padding (multiples of 128, at least 128).
    C1p = _round_up(max(C1, 128), 128)
    C_p = _round_up(max(C_, 128), 128)
    C2p = _round_up(max(C2, 128), 128)

    # Spatial row-tiling.
    TH = _pick_tile_rows(H, W, block_rows)
    R = H // TH
    M_t = TH * W
    P = _round_up(W + 1, 8)   # aligned offset of the main rows in the scratch

    # Fold the BN scale into the conv weights, zero-pad channels, cast to bf16.
    w1p = jnp.zeros((C1p, C_p), bf16).at[:C1, :C_].set((w1 * s1).astype(bf16))
    b1p = jnp.zeros((1, C_p), f32).at[:, :C_].set(b1.astype(f32))
    w2_sc = (w2 * s2.reshape(1, 1, 1, C2)).reshape(9, C_, C2).astype(bf16)
    w2p = jnp.zeros((9, C_p, C2p), bf16).at[:, :C_, :C2].set(w2_sc)
    b2p = jnp.zeros((1, C2p), f32).at[:, :C2].set(b2.astype(f32))

    # NCHW -> (N, H*W, C1p) bf16, row-major over (H, W); pad only if needed.
    x_nhwc = jnp.transpose(x_nchw, (0, 2, 3, 1)).astype(bf16)        # (N,H,W,C1)
    if C1p != C1:
        x_nhwc = jnp.pad(x_nhwc, ((0, 0), (0, 0), (0, 0), (0, C1p - C1)))
    xp = x_nhwc.reshape(N, M, C1p)

    # Per-tile halo rows: image row above / below each tile (zeros at borders;
    # also masked to zero post-cv1 inside the kernel).
    xpad_h = jnp.pad(x_nhwc, ((0, 0), (1, 1), (0, 0), (0, 0)))       # (N,H+2,W,C1p)
    above = xpad_h[:, jnp.arange(R) * TH]                            # (N,R,W,C1p)
    below = xpad_h[:, jnp.arange(R) * TH + TH + 1]
    xh = jnp.stack([above, below], axis=2).reshape(N, R * 2 * W, C1p)

    # Column-validity masks (per tile; tiles always cover whole image rows).
    w_idx = jnp.arange(M_t, dtype=jnp.int32) % W
    not_first = (w_idx != 0).astype(f32).reshape(M_t, 1)
    not_last = (w_idx != (W - 1)).astype(f32).reshape(M_t, 1)

    flops = int(N * (2 * M * C1p * C_p + 2 * R * 2 * W * C1p * C_p
                     + 2 * 9 * M * C_p * C2p))
    bytes_accessed = int(xp.size * 2 + xh.size * 2 + w1p.size * 2 + w2p.size * 2
                         + b1p.size * 4 + b2p.size * 4 + 2 * M_t * 4
                         + N * M * C2p * 2)

    out = pl.pallas_call(
        functools.partial(_bottleneck_kernel, W=W, P=P, add=add),
        grid=(N, R),
        in_specs=[
            pl.BlockSpec((1, M_t, C1p), lambda n, r: (n, r, 0)),     # x tile
            pl.BlockSpec((1, 2 * W, C1p), lambda n, r: (n, r, 0)),   # halo rows
            pl.BlockSpec((C1p, C_p), lambda n, r: (0, 0)),           # w1 (BN folded)
            pl.BlockSpec((1, C_p), lambda n, r: (0, 0)),             # b1
            pl.BlockSpec((9, C_p, C2p), lambda n, r: (0, 0, 0)),     # w2 (BN folded)
            pl.BlockSpec((1, C2p), lambda n, r: (0, 0)),             # b2
            pl.BlockSpec((M_t, 1), lambda n, r: (0, 0)),             # not-first-col
            pl.BlockSpec((M_t, 1), lambda n, r: (0, 0)),             # not-last-col
        ],
        out_specs=pl.BlockSpec((1, M_t, C2p), lambda n, r: (n, r, 0)),
        out_shape=jax.ShapeDtypeStruct((N, M, C2p), bf16),
        scratch_shapes=[pltpu.VMEM((P + M_t + W + 1, C_p), bf16)],
        compiler_params=pltpu.CompilerParams(
            dimension_semantics=("parallel", "parallel")),
        cost_estimate=pl.CostEstimate(
            flops=flops, transcendentals=0, bytes_accessed=bytes_accessed),
    )(xp, xh, w1p, b1p, w2p, b2p, not_first, not_last)

    if C2p != C2:
        out = out[:, :, :C2]
    out = out.reshape(N, H, W, C2)
    return jnp.transpose(out, (0, 3, 1, 2)).astype(x_nchw.dtype)


def init_params(key, c1, c2, e=0.5):
    """Deterministic parameter init (conv weights + folded BatchNorm)."""
    c_ = int(c2 * e)
    ks = jax.random.split(key, 10)
    eps = 1e-5

    # cv1: 1x1 conv weight stored directly as (C1, C_) matmul weight.
    w1 = 0.3 * jax.random.normal(ks[0], (c1, c_), jnp.float32)
    g1 = 1.0 + 0.1 * jax.random.normal(ks[1], (c_,), jnp.float32)
    be1 = 0.1 * jax.random.normal(ks[2], (c_,), jnp.float32)
    mu1 = 0.1 * jax.random.normal(ks[3], (c_,), jnp.float32)
    var1 = jnp.abs(jax.random.normal(ks[4], (c_,), jnp.float32)) + 0.5
    s1 = (g1 / jnp.sqrt(var1 + eps)).reshape(1, c_)
    b1 = (be1 - mu1 * g1 / jnp.sqrt(var1 + eps)).reshape(1, c_)

    # cv2: 3x3 conv weight stored as HWIO (3, 3, C_, C2).
    w2 = 0.3 * jax.random.normal(ks[5], (3, 3, c_, c2), jnp.float32)
    g2 = 1.0 + 0.1 * jax.random.normal(ks[6], (c2,), jnp.float32)
    be2 = 0.1 * jax.random.normal(ks[7], (c2,), jnp.float32)
    mu2 = 0.1 * jax.random.normal(ks[8], (c2,), jnp.float32)
    var2 = jnp.abs(jax.random.normal(ks[9], (c2,), jnp.float32)) + 0.5
    s2 = (g2 / jnp.sqrt(var2 + eps)).reshape(1, c2)
    b2 = (be2 - mu2 * g2 / jnp.sqrt(var2 + eps)).reshape(1, c2)

    return (w1, s1, b1, w2, s2, b2)


def reference_forward(x_nchw, params, *, shortcut=True):
    """Pure-JAX (lax.conv, f32) reference for validation."""
    w1, s1, b1, w2, s2, b2 = params
    c1 = x_nchw.shape[1]
    c2 = w2.shape[-1]
    add = shortcut and (c1 == c2)
    x = jnp.transpose(x_nchw, (0, 2, 3, 1))  # NHWC
    dn = ("NHWC", "HWIO", "NHWC")
    y = lax.conv_general_dilated(x, w1.reshape(1, 1, *w1.shape), (1, 1), "SAME",
                                 dimension_numbers=dn)
    y = jnp.clip(y * s1.reshape(1, 1, 1, -1) + b1.reshape(1, 1, 1, -1), 0.0, 6.0)
    y = lax.conv_general_dilated(y, w2, (1, 1), "SAME", dimension_numbers=dn)
    y = jnp.clip(y * s2.reshape(1, 1, 1, -1) + b2.reshape(1, 1, 1, -1), 0.0, 6.0)
    out = x + y if add else y
    return jnp.transpose(out, (0, 3, 1, 2))


if __name__ == "__main__":
    key = jax.random.PRNGKey(0)
    k_x, k_p = jax.random.split(key)

    N, C1, C2, H, W = 2, 8, 8, 16, 16  # shortcut active since C1 == C2
    x = jax.random.normal(k_x, (N, C1, H, W), jnp.float32)
    params = init_params(k_p, C1, C2, e=0.5)

    # block_rows=128 -> 2 row-tiles per image at this size, so the tiled grid
    # + halo-row path is exercised even on this small test map.
    out = bottleneck_forward(x, params, shortcut=True, block_rows=128)
    out = jax.block_until_ready(out)

    ref = jax.block_until_ready(reference_forward(x, params, shortcut=True))
    assert out.shape == (N, C2, H, W)
    assert jnp.allclose(out, ref, rtol=5e-2, atol=5e-2), "mismatch vs reference"

    print("KERNEL_OK")
</pallas_src>

<mosaic_0001>
module attributes {stable_mosaic.version = 11 : i64} {
  func.func @_bottleneck_kernel(%arg0: i32, %arg1: i32, %arg2: memref<1x128x128xbf16, #tpu.memory_space<vmem>>, %arg3: memref<1x32x128xbf16, #tpu.memory_space<vmem>>, %arg4: memref<128x128xbf16, #tpu.memory_space<vmem>>, %arg5: memref<1x128xf32, #tpu.memory_space<vmem>>, %arg6: memref<9x128x128xbf16, #tpu.memory_space<vmem>>, %arg7: memref<1x128xf32, #tpu.memory_space<vmem>>, %arg8: memref<128x1xf32, #tpu.memory_space<vmem>>, %arg9: memref<128x1xf32, #tpu.memory_space<vmem>>, %arg10: memref<1x128x128xbf16, #tpu.memory_space<vmem>>, %arg11: memref<169x128xbf16, #tpu.memory_space<vmem>>) attributes {dimension_semantics = [#tpu.dimension_semantics<parallel>, #tpu.dimension_semantics<parallel>], iteration_bounds = array<i64: 2, 2>, scalar_prefetch = 0 : i64, scratch_operands = 1 : i64, tpu.core_type = #tpu.core_type<tc>, window_params = [{transform_indices = @transform_0, window_bounds = array<i64: 1, 128, 128>}, {transform_indices = @transform_1, window_bounds = array<i64: 1, 32, 128>}, {pipeline_mode = #tpu.pipeline_mode<synchronous>, transform_indices = @transform_2, window_bounds = array<i64: 128, 128>}, {pipeline_mode = #tpu.pipeline_mode<synchronous>, transform_indices = @transform_3, window_bounds = array<i64: 1, 128>}, {pipeline_mode = #tpu.pipeline_mode<synchronous>, transform_indices = @transform_4, window_bounds = array<i64: 9, 128, 128>}, {pipeline_mode = #tpu.pipeline_mode<synchronous>, transform_indices = @transform_5, window_bounds = array<i64: 1, 128>}, {pipeline_mode = #tpu.pipeline_mode<synchronous>, transform_indices = @transform_6, window_bounds = array<i64: 128, 1>}, {pipeline_mode = #tpu.pipeline_mode<synchronous>, transform_indices = @transform_7, window_bounds = array<i64: 128, 1>}, {transform_indices = @transform_8, window_bounds = array<i64: 1, 128, 128>}]} {
    %c0 = arith.constant 0 : index
    %c0_0 = arith.constant 0 : index
    %c0_1 = arith.constant 0 : index
    %0 = vector.load %arg2[%c0, %c0_0, %c0_1] : memref<1x128x128xbf16, #tpu.memory_space<vmem>>, vector<1x128x128xbf16>
    %1 = vector.shape_cast %0 : vector<1x128x128xbf16> to vector<128x128xbf16>
    %c0_2 = arith.constant 0 : index
    %c0_3 = arith.constant 0 : index
    %c0_4 = arith.constant 0 : index
    %2 = vector.load %arg3[%c0_2, %c0_3, %c0_4] : memref<1x32x128xbf16, #tpu.memory_space<vmem>>, vector<1x32x128xbf16>
    %3 = vector.shape_cast %2 : vector<1x32x128xbf16> to vector<32x128xbf16>
    %c0_5 = arith.constant 0 : index
    %c0_6 = arith.constant 0 : index
    %4 = vector.load %arg4[%c0_5, %c0_6] : memref<128x128xbf16, #tpu.memory_space<vmem>>, vector<128x128xbf16>
    %c0_7 = arith.constant 0 : index
    %c0_8 = arith.constant 0 : index
    %5 = vector.load %arg5[%c0_7, %c0_8] : memref<1x128xf32, #tpu.memory_space<vmem>>, vector<1x128xf32>
    %cst = arith.constant dense<0.000000e+00> : vector<128x128xf32>
    %6 = tpu.matmul %1, %4, %cst {dimension_numbers = #tpu.dot_dimension_numbers<[1], [0], [0], [1], [0, 0, 1, 1], [], []>} : vector<128x128xbf16>, vector<128x128xbf16>, vector<128x128xf32> -> vector<128x128xf32>
    %7 = vector.broadcast %5 : vector<1x128xf32> to vector<128x128xf32>
    %8 = arith.addf %6, %7 : vector<128x128xf32>
    %cst_9 = arith.constant 0.000000e+00 : f32
    %cst_10 = arith.constant 6.000000e+00 : f32
    %9 = vector.broadcast %cst_9 : f32 to vector<128x128xf32>
    %10 = arith.maximumf %9, %8 : vector<128x128xf32>
    %11 = vector.broadcast %cst_10 : f32 to vector<128x128xf32>
    %12 = arith.minimumf %11, %10 : vector<128x128xf32>
    %13 = arith.truncf %12 : vector<128x128xf32> to vector<128x128xbf16>
    %cst_11 = arith.constant dense<0.000000e+00> : vector<32x128xf32>
    %14 = tpu.matmul %3, %4, %cst_11 {dimension_numbers = #tpu.dot_dimension_numbers<[1], [0], [0], [1], [0, 0, 1, 1], [], []>} : vector<32x128xbf16>, vector<128x128xbf16>, vector<32x128xf32> -> vector<32x128xf32>
    %15 = vector.broadcast %5 : vector<1x128xf32> to vector<32x128xf32>
    %16 = arith.addf %14, %15 : vector<32x128xf32>
    %cst_12 = arith.constant 0.000000e+00 : f32
    %cst_13 = arith.constant 6.000000e+00 : f32
    %17 = vector.broadcast %cst_12 : f32 to vector<32x128xf32>
    %18 = arith.maximumf %17, %16 : vector<32x128xf32>
    %19 = vector.broadcast %cst_13 : f32 to vector<32x128xf32>
    %20 = arith.minimumf %19, %18 : vector<32x128xf32>
    %c0_i32 = arith.constant 0 : i32
    %21 = arith.cmpi sgt, %arg1, %c0_i32 : i32
    %22 = arith.extui %21 : i1 to i32
    %23 = arith.sitofp %22 : i32 to f32
    %c1_i32 = arith.constant 1 : i32
    %24 = arith.cmpi slt, %arg1, %c1_i32 : i32
    %25 = arith.extui %24 : i1 to i32
    %26 = arith.sitofp %25 : i32 to f32
    %27 = vector.extract_strided_slice %20 {offsets = [0, 0], sizes = [16, 128], strides = [1, 1]} : vector<32x128xf32> to vector<16x128xf32>
    %28 = vector.broadcast %23 : f32 to vector<16x128xf32>
    %29 = arith.mulf %27, %28 : vector<16x128xf32>
    %30 = arith.truncf %29 : vector<16x128xf32> to vector<16x128xbf16>
    %31 = vector.extract_strided_slice %20 {offsets = [16, 0], sizes = [16, 128], strides = [1, 1]} : vector<32x128xf32> to vector<16x128xf32>
    %32 = vector.broadcast %26 : f32 to vector<16x128xf32>
    %33 = arith.mulf %31, %32 : vector<16x128xf32>
    %34 = arith.truncf %33 : vector<16x128xf32> to vector<16x128xbf16>
    %cst_14 = arith.constant 0.000000e+00 : bf16
    %35 = vector.broadcast %cst_14 : bf16 to vector<1x128xbf16>
    %c7 = arith.constant 7 : index
    %c0_15 = arith.constant 0 : index
    %36 = vector.load %arg11[%c7, %c0_15] : memref<169x128xbf16, #tpu.memory_space<vmem>>, vector<1x128xbf16>
    tpu.vector_store %arg11[%c7, %c0_15], %35 {strides = array<i32>} : memref<169x128xbf16, #tpu.memory_space<vmem>>, vector<1x128xbf16>,
    %c168 = arith.constant 168 : index
    %c0_16 = arith.constant 0 : index
    %37 = vector.load %arg11[%c168, %c0_16] : memref<169x128xbf16, #tpu.memory_space<vmem>>, vector<1x128xbf16>
    tpu.vector_store %arg11[%c168, %c0_16], %35 {strides = array<i32>} : memref<169x128xbf16, #tpu.memory_space<vmem>>, vector<1x128xbf16>,
    %c8 = arith.constant 8 : index
    %c0_17 = arith.constant 0 : index
    %38 = vector.load %arg11[%c8, %c0_17] : memref<169x128xbf16, #tpu.memory_space<vmem>>, vector<16x128xbf16>
    tpu.vector_store %arg11[%c8, %c0_17], %30 {strides = array<i32>} : memref<169x128xbf16, #tpu.memory_space<vmem>>, vector<16x128xbf16>,
    %c24 = arith.constant 24 : index
    %c0_18 = arith.constant 0 : index
    %39 = vector.load %arg11[%c24, %c0_18] : memref<169x128xbf16, #tpu.memory_space<vmem>>, vector<128x128xbf16>
    tpu.vector_store %arg11[%c24, %c0_18], %13 {strides = array<i32>} : memref<169x128xbf16, #tpu.memory_space<vmem>>, vector<128x128xbf16>,
    %c152 = arith.constant 152 : index
    %c0_19 = arith.constant 0 : index
    %40 = vector.load %arg11[%c152, %c0_19] : memref<169x128xbf16, #tpu.memory_space<vmem>>, vector<16x128xbf16>
    tpu.vector_store %arg11[%c152, %c0_19], %34 {strides = array<i32>} : memref<169x128xbf16, #tpu.memory_space<vmem>>, vector<16x128xbf16>,
    %c8_20 = arith.constant 8 : index
    %c0_21 = arith.constant 0 : index
    %41 = vector.load %arg11[%c8_20, %c0_21] : memref<169x128xbf16, #tpu.memory_space<vmem>>, vector<128x128xbf16>
    %c1 = arith.constant 1 : index
    %c0_22 = arith.constant 0 : index
    %c0_23 = arith.constant 0 : index
    %42 = vector.load %arg6[%c1, %c0_22, %c0_23] : memref<9x128x128xbf16, #tpu.memory_space<vmem>>, vector<1x128x128xbf16>
    %43 = vector.shape_cast %42 : vector<1x128x128xbf16> to vector<128x128xbf16>
    %cst_24 = arith.constant dense<0.000000e+00> : vector<128x128xf32>
    %44 = tpu.matmul %41, %43, %cst_24 {dimension_numbers = #tpu.dot_dimension_numbers<[1], [0], [0], [1], [0, 0, 1, 1], [], []>} : vector<128x128xbf16>, vector<128x128xbf16>, vector<128x128xf32> -> vector<128x128xf32>
    %c24_25 = arith.constant 24 : index
    %c0_26 = arith.constant 0 : index
    %45 = vector.load %arg11[%c24_25, %c0_26] : memref<169x128xbf16, #tpu.memory_space<vmem>>, vector<128x128xbf16>
    %c4 = arith.constant 4 : index
    %c0_27 = arith.constant 0 : index
    %c0_28 = arith.constant 0 : index
    %46 = vector.load %arg6[%c4, %c0_27, %c0_28] : memref<9x128x128xbf16, #tpu.memory_space<vmem>>, vector<1x128x128xbf16>
    %47 = vector.shape_cast %46 : vector<1x128x128xbf16> to vector<128x128xbf16>
    %cst_29 = arith.constant dense<0.000000e+00> : vector<128x128xf32>
    %48 = tpu.matmul %45, %47, %cst_29 {dimension_numbers = #tpu.dot_dimension_numbers<[1], [0], [0], [1], [0, 0, 1, 1], [], []>} : vector<128x128xbf16>, vector<128x128xbf16>, vector<128x128xf32> -> vector<128x128xf32>
    %49 = arith.addf %44, %48 : vector<128x128xf32>
    %c40 = arith.constant 40 : index
    %c0_30 = arith.constant 0 : index
    %50 = vector.load %arg11[%c40, %c0_30] : memref<169x128xbf16, #tpu.memory_space<vmem>>, vector<128x128xbf16>
    %c7_31 = arith.constant 7 : index
    %c0_32 = arith.constant 0 : index
    %c0_33 = arith.constant 0 : index
    %51 = vector.load %arg6[%c7_31, %c0_32, %c0_33] : memref<9x128x128xbf16, #tpu.memory_space<vmem>>, vector<1x128x128xbf16>
    %52 = vector.shape_cast %51 : vector<1x128x128xbf16> to vector<128x128xbf16>
    %cst_34 = arith.constant dense<0.000000e+00> : vector<128x128xf32>
    %53 = tpu.matmul %50, %52, %cst_34 {dimension_numbers = #tpu.dot_dimension_numbers<[1], [0], [0], [1], [0, 0, 1, 1], [], []>} : vector<128x128xbf16>, vector<128x128xbf16>, vector<128x128xf32> -> vector<128x128xf32>
    %54 = arith.addf %49, %53 : vector<128x128xf32>
    %c0_35 = arith.constant 0 : index
    %c0_36 = arith.constant 0 : index
    %55 = vector.load %arg8[%c0_35, %c0_36] : memref<128x1xf32, #tpu.memory_space<vmem>>, vector<128x1xf32>
    %c7_37 = arith.constant 7 : index
    %c0_38 = arith.constant 0 : index
    %56 = vector.load %arg11[%c7_37, %c0_38] : memref<169x128xbf16, #tpu.memory_space<vmem>>, vector<128x128xbf16>
    %c0_39 = arith.constant 0 : index
    %c0_40 = arith.constant 0 : index
    %c0_41 = arith.constant 0 : index
    %57 = vector.load %arg6[%c0_39, %c0_40, %c0_41] : memref<9x128x128xbf16, #tpu.memory_space<vmem>>, vector<1x128x128xbf16>
    %58 = vector.shape_cast %57 : vector<1x128x128xbf16> to vector<128x128xbf16>
    %cst_42 = arith.constant dense<0.000000e+00> : vector<128x128xf32>
    %59 = tpu.matmul %56, %58, %cst_42 {dimension_numbers = #tpu.dot_dimension_numbers<[1], [0], [0], [1], [0, 0, 1, 1], [], []>} : vector<128x128xbf16>, vector<128x128xbf16>, vector<128x128xf32> -> vector<128x128xf32>
    %c23 = arith.constant 23 : index
    %c0_43 = arith.constant 0 : index
    %60 = vector.load %arg11[%c23, %c0_43] : memref<169x128xbf16, #tpu.memory_space<vmem>>, vector<128x128xbf16>
    %c3 = arith.constant 3 : index
    %c0_44 = arith.constant 0 : index
    %c0_45 = arith.constant 0 : index
    %61 = vector.load %arg6[%c3, %c0_44, %c0_45] : memref<9x128x128xbf16, #tpu.memory_space<vmem>>, vector<1x128x128xbf16>
    %62 = vector.shape_cast %61 : vector<1x128x128xbf16> to vector<128x128xbf16>
    %cst_46 = arith.constant dense<0.000000e+00> : vector<128x128xf32>
    %63 = tpu.matmul %60, %62, %cst_46 {dimension_numbers = #tpu.dot_dimension_numbers<[1], [0], [0], [1], [0, 0, 1, 1], [], []>} : vector<128x128xbf16>, vector<128x128xbf16>, vector<128x128xf32> -> vector<128x128xf32>
    %64 = arith.addf %59, %63 : vector<128x128xf32>
    %c39 = arith.constant 39 : index
    %c0_47 = arith.constant 0 : index
    %65 = vector.load %arg11[%c39, %c0_47] : memref<169x128xbf16, #tpu.memory_space<vmem>>, vector<128x128xbf16>
    %c6 = arith.constant 6 : index
    %c0_48 = arith.constant 0 : index
    %c0_49 = arith.constant 0 : index
    %66 = vector.load %arg6[%c6, %c0_48, %c0_49] : memref<9x128x128xbf16, #tpu.memory_space<vmem>>, vector<1x128x128xbf16>
    %67 = vector.shape_cast %66 : vector<1x128x128xbf16> to vector<128x128xbf16>
    %cst_50 = arith.constant dense<0.000000e+00> : vector<128x128xf32>
    %68 = tpu.matmul %65, %67, %cst_50 {dimension_numbers = #tpu.dot_dimension_numbers<[1], [0], [0], [1], [0, 0, 1, 1], [], []>} : vector<128x128xbf16>, vector<128x128xbf16>, vector<128x128xf32> -> vector<128x128xf32>
    %69 = arith.addf %64, %68 : vector<128x128xf32>
    %70 = vector.broadcast %55 : vector<128x1xf32> to vector<128x128xf32>
    %71 = arith.mulf %70, %69 : vector<128x128xf32>
    %72 = arith.addf %54, %71 : vector<128x128xf32>
    %c0_51 = arith.constant 0 : index
    %c0_52 = arith.constant 0 : index
    %73 = vector.load %arg9[%c0_51, %c0_52] : memref<128x1xf32, #tpu.memory_space<vmem>>, vector<128x1xf32>
    %c9 = arith.constant 9 : index
    %c0_53 = arith.constant 0 : index
    %74 = vector.load %arg11[%c9, %c0_53] : memref<169x128xbf16, #tpu.memory_space<vmem>>, vector<128x128xbf16>
    %c2 = arith.constant 2 : index
    %c0_54 = arith.constant 0 : index
    %c0_55 = arith.constant 0 : index
    %75 = vector.load %arg6[%c2, %c0_54, %c0_55] : memref<9x128x128xbf16, #tpu.memory_space<vmem>>, vector<1x128x128xbf16>
    %76 = vector.shape_cast %75 : vector<1x128x128xbf16> to vector<128x128xbf16>
    %cst_56 = arith.constant dense<0.000000e+00> : vector<128x128xf32>
    %77 = tpu.matmul %74, %76, %cst_56 {dimension_numbers = #tpu.dot_dimension_numbers<[1], [0], [0], [1], [0, 0, 1, 1], [], []>} : vector<128x128xbf16>, vector<128x128xbf16>, vector<128x128xf32> -> vector<128x128xf32>
    %c25 = arith.constant 25 : index
    %c0_57 = arith.constant 0 : index
    %78 = vector.load %arg11[%c25, %c0_57] : memref<169x128xbf16, #tpu.memory_space<vmem>>, vector<128x128xbf16>
    %c5 = arith.constant 5 : index
    %c0_58 = arith.constant 0 : index
    %c0_59 = arith.constant 0 : index
    %79 = vector.load %arg6[%c5, %c0_58, %c0_59] : memref<9x128x128xbf16, #tpu.memory_space<vmem>>, vector<1x128x128xbf16>
    %80 = vector.shape_cast %79 : vector<1x128x128xbf16> to vector<128x128xbf16>
    %cst_60 = arith.constant dense<0.000000e+00> : vector<128x128xf32>
    %81 = tpu.matmul %78, %80, %cst_60 {dimension_numbers = #tpu.dot_dimension_numbers<[1], [0], [0], [1], [0, 0, 1, 1], [], []>} : vector<128x128xbf16>, vector<128x128xbf16>, vector<128x128xf32> -> vector<128x128xf32>
    %82 = arith.addf %77, %81 : vector<128x128xf32>
    %c41 = arith.constant 41 : index
    %c0_61 = arith.constant 0 : index
    %83 = vector.load %arg11[%c41, %c0_61] : memref<169x128xbf16, #tpu.memory_space<vmem>>, vector<128x128xbf16>
    %c8_62 = arith.constant 8 : index
    %c0_63 = arith.constant 0 : index
    %c0_64 = arith.constant 0 : index
    %84 = vector.load %arg6[%c8_62, %c0_63, %c0_64] : memref<9x128x128xbf16, #tpu.memory_space<vmem>>, vector<1x128x128xbf16>
    %85 = vector.shape_cast %84 : vector<1x128x128xbf16> to vector<128x128xbf16>
    %cst_65 = arith.constant dense<0.000000e+00> : vector<128x128xf32>
    %86 = tpu.matmul %83, %85, %cst_65 {dimension_numbers = #tpu.dot_dimension_numbers<[1], [0], [0], [1], [0, 0, 1, 1], [], []>} : vector<128x128xbf16>, vector<128x128xbf16>, vector<128x128xf32> -> vector<128x128xf32>
    %87 = arith.addf %82, %86 : vector<128x128xf32>
    %88 = vector.broadcast %73 : vector<128x1xf32> to vector<128x128xf32>
    %89 = arith.mulf %88, %87 : vector<128x128xf32>
    %90 = arith.addf %72, %89 : vector<128x128xf32>
    %c0_66 = arith.constant 0 : index
    %c0_67 = arith.constant 0 : index
    %91 = vector.load %arg7[%c0_66, %c0_67] : memref<1x128xf32, #tpu.memory_space<vmem>>, vector<1x128xf32>
    %92 = vector.broadcast %91 : vector<1x128xf32> to vector<128x128xf32>
    %93 = arith.addf %90, %92 : vector<128x128xf32>
    %cst_68 = arith.constant 0.000000e+00 : f32
    %cst_69 = arith.constant 6.000000e+00 : f32
    %94 = vector.broadcast %cst_68 : f32 to vector<128x128xf32>
    %95 = arith.maximumf %94, %93 : vector<128x128xf32>
    %96 = vector.broadcast %cst_69 : f32 to vector<128x128xf32>
    %97 = arith.minimumf %96, %95 : vector<128x128xf32>
    %98 = arith.extf %1 : vector<128x128xbf16> to vector<128x128xf32>
    %99 = arith.addf %97, %98 : vector<128x128xf32>
    %100 = arith.truncf %99 : vector<128x128xf32> to vector<128x128xbf16>
    %c0_70 = arith.constant 0 : index
    %c0_71 = arith.constant 0 : index
    %c0_72 = arith.constant 0 : index
    %101 = vector.load %arg10[%c0_70, %c0_71, %c0_72] : memref<1x128x128xbf16, #tpu.memory_space<vmem>>, vector<1x128x128xbf16>
    %102 = vector.shape_cast %101 : vector<1x128x128xbf16> to vector<128x128xbf16>
    %103 = vector.shape_cast %100 : vector<128x128xbf16> to vector<1x128x128xbf16>
    tpu.vector_store %arg10[%c0_70, %c0_71, %c0_72], %103 {strides = array<i32>} : memref<1x128x128xbf16, #tpu.memory_space<vmem>>, vector<1x128x128xbf16>,
    return
  }
  func.func @transform_0(%arg0: i32, %arg1: i32) -> (i32, i32, i32) {
    %c0_i32 = arith.constant 0 : i32
    %c0_i32_0 = arith.constant 0 : i32
    return %arg0, %arg1, %c0_i32 : i32, i32, i32
  }
  func.func @transform_1(%arg0: i32, %arg1: i32) -> (i32, i32, i32) {
    %c0_i32 = arith.constant 0 : i32
    %c0_i32_0 = arith.constant 0 : i32
    return %arg0, %arg1, %c0_i32 : i32, i32, i32
  }
  func.func @transform_2(%arg0: i32, %arg1: i32) -> (i32, i32) {
    %c0_i32 = arith.constant 0 : i32
    %c0_i32_0 = arith.constant 0 : i32
    %c0_i32_1 = arith.constant 0 : i32
    return %c0_i32, %c0_i32_0 : i32, i32
  }
  func.func @transform_3(%arg0: i32, %arg1: i32) -> (i32, i32) {
    %c0_i32 = arith.constant 0 : i32
    %c0_i32_0 = arith.constant 0 : i32
    %c0_i32_1 = arith.constant 0 : i32
    return %c0_i32, %c0_i32_0 : i32, i32
  }
  func.func @transform_4(%arg0: i32, %arg1: i32) -> (i32, i32, i32) {
    %c0_i32 = arith.constant 0 : i32
    %c0_i32_0 = arith.constant 0 : i32
    %c0_i32_1 = arith.constant 0 : i32
    %c0_i32_2 = arith.constant 0 : i32
    return %c0_i32, %c0_i32_0, %c0_i32_1 : i32, i32, i32
  }
  func.func @transform_5(%arg0: i32, %arg1: i32) -> (i32, i32) {
    %c0_i32 = arith.constant 0 : i32
    %c0_i32_0 = arith.constant 0 : i32
    %c0_i32_1 = arith.constant 0 : i32
    return %c0_i32, %c0_i32_0 : i32, i32
  }
  func.func @transform_6(%arg0: i32, %arg1: i32) -> (i32, i32) {
    %c0_i32 = arith.constant 0 : i32
    %c0_i32_0 = arith.constant 0 : i32
    %c0_i32_1 = arith.constant 0 : i32
    return %c0_i32, %c0_i32_0 : i32, i32
  }
  func.func @transform_7(%arg0: i32, %arg1: i32) -> (i32, i32) {
    %c0_i32 = arith.constant 0 : i32
    %c0_i32_0 = arith.constant 0 : i32
    %c0_i32_1 = arith.constant 0 : i32
    return %c0_i32, %c0_i32_0 : i32, i32
  }
  func.func @transform_8(%arg0: i32, %arg1: i32) -> (i32, i32, i32) {
    %c0_i32 = arith.constant 0 : i32
    %c0_i32_0 = arith.constant 0 : i32
    return %arg0, %arg1, %c0_i32 : i32, i32, i32
  }
}

</mosaic_0001>

<bundles_post_ra>
// kernel: tpu_custom_call.1
= control target key start
LH: loop header
LB: loop body
LE: loop exit
PB: predicated region body
PF: predicated region fallthrough
CT: control target
= control target key end

     0   :  { %s6012_s0 = inlined_call_operand.vmem [shape: bf16[2,256,128], index: 0, kind: input, shape index: {}]   ;;  %s6013_s1 = inlined_call_operand.hbm [shape: bf16[2,64,128], index: 1, kind: input, shape index: {}]   ;;  %s6014_s2 = inlined_call_operand.hbm [shape: bf16[128,128], index: 2, kind: input, shape index: {}]   ;;  %s6015_s3 = inlined_call_operand.vmem [shape: f32[1,128], index: 3, kind: input, shape index: {}]   ;;  %s6016_s4 = inlined_call_operand.hbm [shape: bf16[9,128,128], index: 4, kind: input, shape index: {}]   ;;  %s6017_s5 = inlined_call_operand.vmem [shape: f32[1,128], index: 5, kind: input, shape index: {}]   ;;  %s6018_s6 = inlined_call_operand.vmem [shape: f32[128,1], index: 6, kind: input, shape index: {}]   ;;  %s6019_s7 = inlined_call_operand.vmem [shape: f32[128,1], index: 7, kind: input, shape index: {}]   ;;  %s6020_s8 = inlined_call_operand.hbm [shape: bf16[2,256,128], index: 8, kind: output, shape index: {}]  }
   0x1   :  { %6035 = sst [smem:[#allocation17_spill]] %s6014_s2 }
   0x2   :  { %6036 = sst [smem:[#allocation18_spill]] %s6016_s4 }
   0x3   :  { %6037 = sst [smem:[#allocation19_spill]] %s6017_s5 }
   0x4   :  { %6038 = sst [smem:[#allocation20_spill]] %s6018_s6 }
   0x5   :  { %6039 = sst [smem:[#allocation21_spill]] %s6019_s7 }
   0x6   :  { %6040 = sst [smem:[#allocation22_spill]] %s6020_s8 }
   0x7   :  { %13 = vsyncpa [#allocation4], 0 }
   0x8   :  { %15 = vsyncpa [#allocation4 + $0x1], 0 }
   0x9   :  { %16 = vsyncpa [#allocation7], 0 }
   0xa   :  { %17 = vsyncpa [#allocation5], 0 }
   0xb   :  { %19 = vsyncpa [#allocation5 + $0x1], 0  ;;  %s5089_s27 = smov 0   ;;  %s5091_s28 = smov 0  }
   0xc   :  { %s5093_s29 = smov 0   ;;  %s5095_s30 = smov 0  }
   0xd   :  { %s5097_s9 = smov 0   ;;  %s5099_s10 = smov 0  }
   0xe   :  { %s5101_s11 = smov 0   ;;  %s5103_s12 = smov 0  }
   0xf LB: > { %6041 = sst [smem:[#allocation13_spill]] %s5005_s27  ;;  %s3614_s13 = sadd.s32 4294967295, %s5033_s12   ;;  %s5033_s12 = sphi %s5103_s12, %s25_s12   ;;  %s5029_s11 = sphi %s5101_s11, %s6078_s11   ;;  %s5025_s10 = sphi %s5099_s10, %s6077_s10   ;;  %s5021_s9 = sphi %s5097_s9, %s6076_s9   ;;  %s5017_s30 = sphi %s5095_s30, %s6075_s30   ;;  %s5013_s29 = sphi %s5093_s29, %s6074_s29   ;;  %s5009_s28 = sphi %s5091_s28, %s6073_s28   ;;  %s5005_s27 = sphi %s5089_s27, %s6072_s27  }
  0x10   : > { %s3615_s14 = sadd.s32 4294967294, %s5033_s12   ;;  %p87_p0 = scmp.ne.s32.totalorder %s5009_s28, %s5005_s27 }
  0x11   : > { %p5133_p1 = scmp.eq.s32.totalorder %s3614_s13, 0  ;;  %p5137_p2 = scmp.eq.s32.totalorder %s3614_s13, 3 }
  0x12   : > { %p245_p3 = scmp.eq.s32.totalorder %s3615_s14, 3  ;;  %p3616_p5 = scmp.ge.s32.totalorder %s5033_s12, 1 }
  0x13   : > { %s6042_s15 = scalar_select %p5133_p1, 1, 0 }
  0x14   : > { %s6043_s16 = scalar_select %p5137_p2, 1, 0 }
  0x15   : > { %p5143_p4 = por %p5133_p1, %p87_p0  ;;  %p5148_p6 = por %p245_p3, %p87_p0 }
  0x16   : > { %p252_p7 = scmp.lt.s32.totalorder %s5033_s12, 5  ;;  %s5035_s20 = smov [#allocation6]  }
  0x17   : > { %s6044_s17 = scalar_select %p5143_p4, 1, 0 }
  0x18   : > { %s6045_s18 = scalar_select %p5148_p6, 1, 0 }
  0x19   : > { %p5153_p8 = pnand %p3616_p5, %p252_p7  ;;  %s264_s21 = sshll.u32 %s5035_s20, 4  ;;  %s265_s21 = int_to_ptr.vmem [resolvable:$true] %s264_s21 }
  0x1a   : > { %6046 = sst [smem:[#allocation14_spill]] %s6045_s18  ;;  %s5036_s23 = smov [#allocation8]  }
  0x1b   : > { %s6047_s19 = scalar_select %p5153_p8, 1, 0 }
  0x1c   : > { %p4589_p9 = pneg %p5153_p8  ;;  %s280_s24 = sshll.u32 %s5036_s23, 4  ;;  %s5165_s24 = int_to_ptr.vmem [resolvable:$true] %s280_s24 }
  0x1d   : > { %s6049_s2 = sld [smem:[#allocation17_spill]] }
  0x1e   : > { %p5161_p10 = pnand %p4589_p9, %p5133_p1 }
  0x20   : > { %p4847_p12 = pneg %p5161_p10 }
  0x23   : > { %s4845_s13 = scalar_lea.hbm %s6049_s2, 1024 }
  0x24   : > { %p4846_p11 = scmp.ne.s32.totalorder %s6049_s2, %s4845_s13  ;;  %p4852_p3 = scmp.lt.u32.totalorder %s4845_s13, %s6049_s2 }
  0x26   : > { %p4848_p13 = pnand %p4847_p12, %p4846_p11 }
  0x28   : > { %p4849_p0 = pneg %p4848_p13 }
  0x2a   : > { %p4854_p5 = pnand %p4852_p3, %p4849_p0 }
  0x2c   : > { %4857 = shalt.err (!%p4854_p5)
}
  0x2d   : > { %s4858_s23 = scalar_lea.vmem %s265_s21, 1024  ;;  %p4866_p1 = scmp.lt.s32.totalorder %s265_s21, %s265_s21 }
  0x2e   : > { %p4859_p7 = scmp.ne.s32.totalorder %s265_s21, %s4858_s23  ;;  %p4867_p4 = scmp.lt.s32.totalorder %s4858_s23, %s4858_s23 }
  0x30   : > { %p4861_p9 = pnand %p4859_p7, %p4847_p12  ;;  %p4868_p8 = por %p4867_p4, %p4866_p1 }
  0x32   : > { %p4862_p6 = pneg %p4861_p9 }
  0x34   : > { %p4869_p2 = pnand %p4868_p8, %p4862_p6 }
  0x36   : > { %4872 = shalt.err (!%p4869_p2)
}
  0x37   : > { %s6029_s25 = smov 64   ;;  %s6030_s26 = smov 4  }
  0x38   : > { %4592 = dma.hbm_to_vmem [thread:$0]  (!%p5161_p10), %s6049_s2, 1024, %s265_s21, [#allocation7], %s6029_s25, %s6029_s25, %s6030_s26  }
  0x39   : > { %s6050_s4 = sld [smem:[#allocation18_spill]] }
  0x3f   : > { %s4873_s20 = scalar_lea.hbm %s6050_s4, 9216 }
  0x40   : > { %p4874_p1 = scmp.ne.s32.totalorder %s6050_s4, %s4873_s20  ;;  %p4880_p6 = scmp.lt.u32.totalorder %s4873_s20, %s6050_s4 }
  0x42   : > { %p4876_p2 = pnand %p4874_p1, %p4847_p12 }
  0x44   : > { %p4877_p4 = pneg %p4876_p2 }
  0x46   : > { %p4882_p8 = pnand %p4880_p6, %p4877_p4 }
  0x48   : > { %4885 = shalt.err (!%p4882_p8)
}
  0x49   : > { %s4886_s21 = scalar_lea.vmem %s5165_s24, 9216  ;;  %p4894_p3 = scmp.lt.s32.totalorder %s5165_s24, %s5165_s24 }
  0x4a   : > { %p4887_p11 = scmp.ne.s32.totalorder %s5165_s24, %s4886_s21  ;;  %p4895_p5 = scmp.lt.s32.totalorder %s4886_s21, %s4886_s21 }
  0x4c   : > { %p4889_p13 = pnand %p4887_p11, %p4847_p12  ;;  %p4896_p7 = por %p4895_p5, %p4894_p3 }
  0x4e   : > { %p4890_p0 = pneg %p4889_p13 }
  0x50   : > { %p4897_p9 = pnand %p4896_p7, %p4890_p0 }
  0x52   : > { %4900 = shalt.err (!%p4897_p9)
}
  0x53   : > { %4595 = dma.hbm_to_vmem [thread:$0]  (!%p5161_p10), %s6050_s4, 9216, %s5165_s24, [#allocation7], %s6029_s25, %s6029_s25, %s6030_s26  }
  0x54   : > { %s34_s8 = sadd.s32 1, %s5025_s10  ;;  %s37_s22 = sadd.s32 1, %s5029_s11 }
  0x55   : > { %p35_p12 = scmp.ge.s32.totalorder %s34_s8, 2  ;;  %s74_s27 = sadd.s32 1, %s5013_s29 }
  0x56   : > { %p81_p1 = scmp.ne.s32.totalorder %s5013_s29, %s5009_s28  ;;  %p82_p2 = scmp.eq.s32.totalorder %s5033_s12, 0 }
  0x57   : > { %s6080_s8 = smov (%p35_p12, %s34_s8), 0  ;;  %s6082_s22 = smov (!%p35_p12, %s37_s22), %s5029_s11 }
  0x58   : > { %6051 = sst [smem:[#allocation15_spill]] %s6080_s8  ;;  %s70_s18 = ssub.s32 %s5025_s10, %s6080_s8 }
  0x59   : > { %p5231_p4 = por %p82_p2, %p81_p1  ;;  %p39_p10 = scmp.ge.s32.totalorder %s6082_s22, 2 }
  0x5a   : > { %p6053_p6 = scmp.ne.s32.totalorder %s6043_s16, 0  ;;  %p4606_p11 = scmp.lt.s32.totalorder %s5033_s12, 4 }
  0x5b   : > { %s316_s14 = sand.u32 1, %s5013_s29   ;;  %s6084_s22 = smov (%p39_p10, %s6082_s22), 0 }
  0x5c   : > { %p5237_p8 = por %p6053_p6, %p81_p1  ;;  %s3620_s20 = sshll.u32 %s316_s14, 4 }
  0x5d   : > { %s69_s23 = ssub.s32 %s5029_s11, %s6084_s22  ;;  %s3621_s5 = sshll.u32 %s5025_s10, 2 }
  0x5e   : > { %s6054_s24 = scalar_select %p5237_p8, 1, 0 }
  0x5f   : > { %s71_s21 = sor.u32 %s70_s18, %s69_s23  ;;  %s3622_s7 = sshll.u32 %s5029_s11, 3 }
  0x60   : > { %6055 = sst [smem:[#allocation16_spill]] %s6054_s24  ;;  %p72_p13 = scmp.eq.s32.totalorder %s71_s21, 0 }
  0x61   : > { %s326_s25 = sadd.s32 %s3622_s7, %s3621_s5  ;;  %s320_s26 = scalar_lea.vmem [#allocation3], %s3620_s20 }
  0x62   : > { %s329_s16 = sshll.u32 %s320_s26, 4  ;;  %s3623_s4 = sshll.u32 %s326_s25, 6  ;;  %s5252_s16 = int_to_ptr.vmem [resolvable:$true] %s329_s16 }
  0x63   : > { %s5250_s2 = scalar_select %p72_p13, %s5013_s29, %s74_s27  }
  0x64   : > { %s5257_s6 = scalar_lea.hbm %s6013_s1, %s3623_s4  ;;  %p5263_p0 = pnand %p4606_p11, %p5231_p4 }
  0x65   : > { %s5267_s25 = scalar_lea.sflag [#allocation4], %s316_s14  ;;  %s4901_s26 = scalar_lea.hbm %s5257_s6, 256 }
  0x66   : > { %p4902_p3 = scmp.ne.s32.totalorder %s5257_s6, %s4901_s26  ;;  %p4903_p5 = pneg %p5263_p0 }
  0x67   : > { %s4906_s27 = scalar_lea.hbm %s6013_s1, 1024  ;;  %p4907_p12 = scmp.lt.u32.totalorder %s5257_s6, %s6013_s1 }
  0x68   : > { %p4904_p7 = pnand %p4903_p5, %p4902_p3  ;;  %p4908_p1 = scmp.lt.u32.totalorder %s4906_s27, %s4901_s26 }
  0x69   : > { %p4910_p4 = scmp.lt.u32.totalorder %s4901_s26, %s5257_s6 }
  0x6a   : > { %p4905_p9 = pneg %p4904_p7  ;;  %p4909_p2 = por %p4908_p1, %p4907_p12 }
  0x6c   : > { %p4911_p10 = por %p4910_p4, %p4909_p2 }
  0x6e   : > { %p4912_p6 = pnand %p4911_p10, %p4905_p9 }
  0x70   : > { %4915 = shalt.err (!%p4912_p6)
}
  0x71   : > { %s4916_s14 = scalar_lea.vmem %s5252_s16, 256  ;;  %s5039_s20 = smov [#allocation3]  }
  0x72   : > { %p4917_p11 = scmp.ne.s32.totalorder %s5252_s16, %s4916_s14  ;;  %s4921_s23 = sshll.u32 %s5039_s20, 4  ;;  %s4922_s23 = int_to_ptr.vmem [resolvable:$false] %s4921_s23 }
  0x73   : > { %s4923_s21 = scalar_lea.vmem %s4922_s23, 512  ;;  %p4924_p7 = scmp.lt.s32.totalorder %s5252_s16, %s4922_s23 }
  0x74   : > { %p4919_p13 = pnand %p4917_p11, %p4903_p5  ;;  %p4925_p12 = scmp.lt.s32.totalorder %s4923_s21, %s4916_s14 }
  0x76   : > { %p4920_p3 = pneg %p4919_p13  ;;  %p4926_p1 = por %p4925_p12, %p4924_p7 }
  0x78   : > { %p4927_p2 = pnand %p4926_p1, %p4920_p3 }
  0x7a   : > { %4930 = shalt.err (!%p4927_p2)
}
  0x7b   : > { %s6057_s5 = smov 4   ;;  %s6058_s7 = smov 64  }
  0x7c   : > { %4599 = dma.hbm_to_vmem [thread:$0]  (!%p5263_p0), %s5257_s6, 256, %s5252_s16, %s5267_s25, %s6058_s7, %s6058_s7, %s6057_s5  }
  0x7d   : > { %p6059_p5 = scmp.ne.s32.totalorder %s6047_s19, 0 }
  0x7e   : > { %s5301_s26 = sand.u32 (!%p6059_p5), 1, %s5009_s28   ;;  %p6060_p9 = scmp.ne.s32.totalorder (!%p6059_p5), %s6044_s17, 0 }
  0x7f   : > { %341 = sbr.rel (%p6059_p5) target bundleno = 824 (0x338), region = 52  ;;  %s3625_s4 = sshll.u32 (!%p6059_p5), %s5301_s26, 4 }
  0x80   : > { %s344_s8 = scalar_lea.sflag (!%p6059_p5), [#allocation4], %s5301_s26  ;;  %s5305_s27 = scalar_lea.vmem (!%p6059_p5), [#allocation3], %s3625_s4 }
  0x86   : > { %4992 = dma.done.wait (%p6060_p9), %s344_s8, 256  }
  0x87   : > { %4994 = vsyncadd (%p6060_p9), %s344_s8, 4294967040  ;;  %p6061_p0 = scmp.ne.s32.totalorder %s6042_s15, 0 }
  0x89   : > { %4996 = dma.done.wait (%p6061_p0), [#allocation7], 10240  }
  0x8a   : > { %4998 = vsyncadd (%p6061_p0), [#allocation7], 4294957056  ;;  %s5316_s6 = sshll.u32 %s5017_s30, 4  ;;  %p398_p4 = scmp.lt.s32.totalorder %s5021_s9, 1  ;;  %v4683_v0 = vld [vmem:[#allocation6] sm:$0xff]   ;;  %v4684_v1 = vld [vmem:[#allocation6 + $0x8] sm:$0xff]  }
  0x8b   : > { %p400_p10 = scmp.lt.s32.totalorder %s5316_s6, 31  ;;  %4125 = vmatprep.subr.bf16.mxu1 %v4683_v0  ;;  %v4685_v2 = vld [vmem:[#allocation6 + $0x10] sm:$0xff]   ;;  %v4686_v3 = vld [vmem:[#allocation6 + $0x18] sm:$0xff]   ;;  %v4687_v5 = vld [vmem:[#allocation6 + $0x20] sm:$0xff]   ;;  %vm769_vm0 = vcmask 1043459   ;;  %vm775_vm3 = vcmask 1040384  }
  0x8c   : > { %s399_s19 = scalar_select %p398_p4, %s5021_s9, 1  ;;  %4126 = vmatpush3.bf16.msra.mxu1 %v4683_v0  ;;  %v4701_v6 = vld [vmem:[#allocation8 + $0x100] sm:$0xff]   ;;  %v4688_v7 = vld [vmem:[#allocation6 + $0x28] sm:$0xff]   ;;  %v4689_v8 = vld [vmem:[#allocation6 + $0x30] sm:$0xff]   ;;  %vm770_vm1 = vsmask.f32 7950 }
  0x8d   : > { %s401_s16 = scalar_select %p400_p10, %s5316_s6, 31  ;;  %4127 = vmatprep.subr.bf16.mxu1 %v4684_v1  ;;  %4177 = vmatprep.subr.bf16.mxu0 %v4701_v6  ;;  %v4690_v9 = vld [vmem:[#allocation6 + $0x38] sm:$0xff]   ;;  %v4699_v17 = vld [vmem:[%s5305_s27] sm:$0xff]   ;;  %v4702_v19 = vld [vmem:[#allocation8 + $0x108] sm:$0xff]   ;;  %vm776_vm4 = vsmask.f32 256 }
  0x8e   : > { %s3630_s18 = sshll.u32 %s399_s19, 5  ;;  %4178 = vmatpush3.bf16.msra.mxu0 %v4701_v6  ;;  %v4700_v18 = vld [vmem:[%s5305_s27 + $0x8] sm:$0xff]   ;;  %v4703_v20 = vld [vmem:[#allocation8 + $0x110] sm:$0xff]   ;;  %v4705_v22 = vld [vmem:[#allocation8 + $0x120] sm:$0xff]   ;;  %p758_p6 = scmp.lt.s32.totalorder %s5017_s30, 1 }
  0x8f   : > { %s403_s17 = sadd.s32 %s3630_s18, %s401_s16  ;;  %4179 = vmatprep.subr.bf16.mxu0 %v4702_v19  ;;  %v4704_v21 = vld [vmem:[#allocation8 + $0x118] sm:$0xff]   ;;  %v4706_v23 = vld [vmem:[#allocation8 + $0x128] sm:$0xff]   ;;  %v4707_v24 = vld [vmem:[#allocation8 + $0x130] sm:$0xff]   ;;  %p755_p11 = scmp.gt.s32.totalorder %s5017_s30, 0  ;;  %vm1571_vm6 = vsmask.f32 4352 }
  0x90   : > { %s3631_s25 = sshll.u32 %s403_s17, 2  ;;  %4128 = vmatpush3.bf16.msra.mxu1 %v4684_v1  ;;  %v4710_v25 = vld [vmem:[#allocation8 + $0x138] sm:$0xff]   ;;  %v5337_v26 = vld [vmem:[#allocation8 + $0x40] sm:$0xff]   ;;  %v4719_v28 = vld [vmem:[#allocation8 + $0xc8] sm:$0xff]   ;;  %s6062_s8 = sld [smem:[#allocation20_spill]] }
  0x91   : > { %s5325_s24 = scalar_lea.vmem %s6012_s0, %s3631_s25  ;;  %4129 = vmatprep.subr.bf16.mxu1 %v4685_v2  ;;  %v4715_v27 = vld [vmem:[#allocation8 + $0xc0] sm:$0xff]   ;;  %v4723_v29 = vld [vmem:[#allocation8 + $0xd0] sm:$0xff]   ;;  %v4727_v30 = vld [vmem:[#allocation8 + $0xd8] sm:$0xff]   ;;  %vm2488_vm7 = vsmask.f32 7424  ;;  %s6063_s27 = sld [smem:[#allocation21_spill]] }
  0x92   : > { %v410_v4 = vld [vmem:[%s5325_s24] sm:$0xff]   ;;  %v412_v10 = vld [vmem:[%s5325_s24 + $0x8] sm:$0xff]   ;;  %v414_v11 = vld [vmem:[%s5325_s24 + $0x10] sm:$0xff]   ;;  %4180 = vmatpush3.bf16.msra.mxu0 %v4702_v19  ;;  %s5393_s23 = scalar_select %p758_p6, 1, 0 }
  0x93   : > { %4141 = vmatprep.mubr.bf16.mxu1 %v410_v4  ;;  %v416_v12 = vld [vmem:[%s5325_s24 + $0x18] sm:$0xff]   ;;  %v418_v13 = vld [vmem:[%s5325_s24 + $0x20] sm:$0xff]   ;;  %v420_v14 = vld [vmem:[%s5325_s24 + $0x28] sm:$0xff]   ;;  %4181 = vmatprep.subr.bf16.mxu0 %v4703_v20  ;;  %s5398_s21 = scalar_select %p755_p11, 1, 0 }
  0x94   : > { %4130 = vmatpush3.bf16.msra.mxu1 %v4685_v2  ;;  %v422_v15 = vld [vmem:[%s5325_s24 + $0x30] sm:$0xff]   ;;  %v424_v16 = vld [vmem:[%s5325_s24 + $0x38] sm:$0xff]   ;;  %vm771_vm2 = vmand %vm769_vm0, %vm770_vm1  ;;  %s760_s5 = scvt.s32.f32 %s5393_s23  ;;  %s6065_s17 = sld [smem:[#allocation19_spill]] }
  0x95   : > { %4131 = vmatprep.subr.bf16.mxu1 %v4686_v3  ;;  %v772_v31 = vld [vmem:[#allocation2] sm:$0x8]  ;;  %v4732_v33 = vld [vmem:[#allocation8 + $0xe0] sm:$0xff]   ;;  %v4741_v35 = vld [vmem:[#allocation8 + $0xf0] sm:$0xff]   ;;  %s757_s30 = scvt.s32.f32 %s5398_s21  ;;  %s3628_s25 = sshll.u32 %s5301_s26, 6 }
  0x96   : > { %4182 = vmatpush3.bf16.msra.mxu0 %v4703_v20  ;;  %v773_v32 = vsel %vm771_vm2, 0, %v772_v31  ;;  %v4734_v34 = vld [vmem:[#allocation8 + $0xe8] sm:$0xff]   ;;  %v4743_v36 = vld [vmem:[#allocation8 + $0xf8] sm:$0xff]   ;;  %v5340_v37 = vld [vmem:[#allocation8] sm:$0xff]   ;;  %s5907_s15 = scalar_lea.vmem [#allocation9], %s3628_s25  ;;  %s3820_s13 = sshll.u32 %s5021_s9, 5 }
  0x97   : > { %4183 = vmatprep.subr.bf16.mxu0 %v4704_v21  ;;  %774 = vst [vmem:[#allocation2] sm:$0x8] %v773_v32  ;;  %vm777_vm5 = vmand %vm775_vm3, %vm776_vm4  ;;  %v778_v38 = vld [vmem:[#allocation2 + $0x54] sm:$0x1]  ;;  %v5346_v40 = vld [vmem:[%s6015_s3] ss:$0 sm:$0xff]  ;;  %s6064_s19 = smov %s6063_s27  ;;  %s3484_s14 = sadd.s32 %s3820_s13, %s5316_s6 }
  0x98   : > { %4132 = vmatpush3.bf16.msra.mxu1 %v4686_v3  ;;  %v779_v39 = vsel %vm777_vm5, 0, %v778_v38  ;;  %s3487_s20 = sshll.u32 %s5907_s15, 4  ;;  %s6067_s6 = sld [smem:[#allocation22_spill]]  ;;  %s5956_s20 = int_to_ptr.vmem [resolvable:$true] %s3487_s20 }
  0x99   : > { %4133 = vmatprep.subr.bf16.mxu1 %v4687_v5  ;;  %780 = vst [vmem:[#allocation2 + $0x54] sm:$0x1] %v779_v39  ;;  %s4931_s7 = scalar_lea.vmem %s5956_s20, 1024  ;;  %s5041_s4 = smov [#allocation9]  }
  0x9a   : > { %4184 = vmatpush3.bf16.msra.mxu0 %v4704_v21  ;;  %p4932_p13 = scmp.ne.s32.totalorder %s5956_s20, %s4931_s7 }
  0x9b   : > { %4185 = vmatprep.subr.bf16.mxu0 %v4705_v22 }
  0x9c   : > { %4134 = vmatpush3.bf16.msra.mxu1 %v4687_v5  ;;  %p4933_p3 = pnand %p4932_p13, %p5237_p8 }
  0x9d   : > { %4135 = vmatprep.subr.bf16.mxu1 %v4688_v7 }
  0x9e   : > { %4186 = vmatpush3.bf16.msra.mxu0 %v4705_v22  ;;  %p4934_p7 = pneg %p4933_p3 }
  0x9f   : > { %4187 = vmatprep.subr.bf16.mxu0 %v4706_v23 }
  0xa0   : > { %4136 = vmatpush3.bf16.msra.mxu1 %v4688_v7 }
  0xa1   : > { %4137 = vmatprep.subr.bf16.mxu1 %v4689_v8 }
  0xa2   : > { %4188 = vmatpush3.bf16.msra.mxu0 %v4706_v23 }
  0xa3   : > { %4189 = vmatprep.subr.bf16.mxu0 %v4707_v24 }
  0xa4   : > { %4138 = vmatpush3.bf16.msra.mxu1 %v4689_v8 }
  0xa5   : > { %4139 = vmatprep.subr.bf16.mxu1 %v4690_v9 }
  0xa6   : > { %4190 = vmatpush3.bf16.msra.mxu0 %v4707_v24 }
  0xa7   : > { %4191 = vmatprep.subr.bf16.mxu0 %v4710_v25 }
  0xa8   : > { %4140 = vmatpush3.bf16.msra.mxu1 %v4690_v9 }
  0xa9   : > { %4157 = vmatprep.subr.bf16.mxu1 %v4683_v0 }
  0xaa   : > { %4192 = vmatpush3.bf16.msra.mxu0 %v4710_v25 }
  0xab   : > { %4142 = vmatmul.mubr.bf16.vlgmr.msra.gmra.mrb[0].mxu1 %v412_v10  ;;  %4209 = vmatprep.subr.bf16.mxu0 %v5337_v26 }
  0xac   : > { %4158 = vmatpush3.bf16.msra.mxu1 %v4683_v0  ;;  %4145 = vmatprep.mubr.bf16.mxu1 %v414_v11 }
  0xad   : > { %4159 = vmatprep.subr.bf16.mxu1 %v4684_v1 }
  0xb0   : > { %4160 = vmatpush3.bf16.msra.mxu1 %v4684_v1 }
  0xb1   : > { %4161 = vmatprep.subr.bf16.mxu1 %v4685_v2 }
  0xb3   : > { %4146 = vmatmul.mubr.bf16.gmra.mrb[4].mxu1 %v416_v12 }
  0xb4   : > { %4162 = vmatpush3.bf16.msra.mxu1 %v4685_v2  ;;  %4149 = vmatprep.mubr.bf16.mxu1 %v418_v13 }
  0xb5   : > { %4163 = vmatprep.subr.bf16.mxu1 %v4686_v3 }
  0xb8   : > { %4164 = vmatpush3.bf16.msra.mxu1 %v4686_v3 }
  0xb9   : > { %4165 = vmatprep.subr.bf16.mxu1 %v4687_v5 }
  0xbb   : > { %4150 = vmatmul.mubr.bf16.gmra.mrb[8].mxu1 %v420_v14 }
  0xbc   : > { %4166 = vmatpush3.bf16.msra.mxu1 %v4687_v5  ;;  %4153 = vmatprep.mubr.bf16.mxu1 %v422_v15 }
  0xbd   : > { %4167 = vmatprep.subr.bf16.mxu1 %v4688_v7 }
  0xc0   : > { %4168 = vmatpush3.bf16.msra.mxu1 %v4688_v7 }
  0xc1   : > { %4169 = vmatprep.subr.bf16.mxu1 %v4689_v8 }
  0xc3   : > { %4154 = vmatmul.mubr.bf16.gmra.mrb[12].mxu1 %v424_v16 }
  0xc4   : > { %4170 = vmatpush3.bf16.msra.mxu1 %v4689_v8  ;;  %4173 = vmatprep.mubr.bf16.mxu1 %v4699_v17 }
  0xc5   : > { %4171 = vmatprep.subr.bf16.mxu1 %v4690_v9 }
  0xc8   : > { %4172 = vmatpush3.bf16.msra.mxu1 %v4690_v9 }
  0xc9   : > { %4273 = vmatprep.subr.bf16.mxu1 %v4715_v27 }
  0xcb   : > { %4174 = vmatmul.mubr.bf16.vlgmr.msra.gmra.mrb[16].mxu1 %v4700_v18 }
  0xcc   : > { %4274 = vmatpush3.bf16.msra.mxu1 %v4715_v27 }
  0xcd   : > { %4275 = vmatprep.subr.bf16.mxu1 %v4719_v28 }
  0xd0   : > { %4276 = vmatpush3.bf16.msra.mxu1 %v4719_v28 }
  0xd1   : > { %4277 = vmatprep.subr.bf16.mxu1 %v4723_v29 }
  0xd4   : > { %4278 = vmatpush3.bf16.msra.mxu1 %v4723_v29 }
  0xd5   : > { %4279 = vmatprep.subr.bf16.mxu1 %v4727_v30 }
  0xd8   : > { %4280 = vmatpush3.bf16.msra.mxu1 %v4727_v30 }
  0xd9   : > { %4281 = vmatprep.subr.bf16.mxu1 %v4732_v33 }
  0xdc   : > { %4282 = vmatpush3.bf16.msra.mxu1 %v4732_v33 }
  0xdd   : > { %4283 = vmatprep.subr.bf16.mxu1 %v4734_v34 }
  0xe0   : > { %4284 = vmatpush3.bf16.msra.mxu1 %v4734_v34 }
  0xe1   : > { %4285 = vmatprep.subr.bf16.mxu1 %v4741_v35 }
  0xe4   : > { %4286 = vmatpush3.bf16.msra.mxu1 %v4741_v35 }
  0xe5   : > { %4287 = vmatprep.subr.bf16.mxu1 %v4743_v36 }
  0xe8   : > { %4288 = vmatpush3.bf16.msra.mxu1 %v4743_v36 }
  0xe9   : > { %4305 = vmatprep.subr.bf16.mxu1 %v5340_v37 }
 0x17e   : > { %v4143_v41 = vpop.f32.mrb[0].mxu1 }
 0x17f   : > { %v592_v42 = vadd.f32 %v4143_v41, %v5346_v40  ;;  %v583_v43 = vpop.f32.mrb[1].mxu1 }
 0x180   : > { %v584_v44 = vadd.f32 %v5346_v40, %v583_v43  ;;  %v4144_v45 = vpop.f32.mrb[2].mxu1 }
 0x181   : > { %v586_v46 = vpop.f32.mrb[3].mxu1  ;;  %v648_v47 = vmax.f32 %v592_v42, 0.0  ;;  %v595_v51 = vadd.f32 %v4144_v45, %v5346_v40 }
 0x182   : > { %v646_v48 = vmax.f32 %v584_v44, 0.0  ;;  %v587_v49 = vadd.f32 %v5346_v40, %v586_v46  ;;  %v4716_v44 = vld [vmem:[#allocation8 + $0x48] sm:$0xff]  }
 0x183   : > { %v664_v53 = vmin.f32 %v648_v47, 6.0  ;;  %v649_v59 = vmax.f32 %v595_v51, 0.0 }
 0x184   : > { %v662_v50 = vmin.f32 %v646_v48, 6.0  ;;  %v647_v52 = vmax.f32 %v587_v49, 0.0 }
 0x185   : > { %v665_v3 = vmin.f32 %v649_v59, 6.0 }
 0x186   : > { %v3826_v54 = vpack.c.bf16 %v662_v50, %v662_v50  ;;  %v663_v55 = vmin.f32 %v647_v52, 6.0  ;;  %v4147_v56 = vpop.f32.mrb[4].mxu1 }
 0x187   : > { %v608_v57 = vadd.f32 %v4147_v56, %v5346_v40  ;;  %v599_v58 = vpop.f32.mrb[5].mxu1  ;;  %v4720_v56 = vld [vmem:[#allocation8 + $0x50] sm:$0xff]  }
 0x188   : > { %846 = vst [vmem:[#allocation2 + $0xc] sm:$0xf] %v3826_v54  ;;  %v3863_v60 = vpack.c.bf16 %v664_v53, %v663_v55  ;;  %v600_v61 = vadd.f32 %v5346_v40, %v599_v58  ;;  %v4148_v62 = vpop.f32.mrb[6].mxu1 }
 0x189   : > { %v602_v63 = vpop.f32.mrb[7].mxu1  ;;  %v652_v0 = vmax.f32 %v608_v57, 0.0  ;;  %v611_v5 = vadd.f32 %v4148_v62, %v5346_v40 }
 0x18a   : > { %3940 = vst [vmem:[#allocation2 + $0x10] sm:$0xff] %v3863_v60   ;;  %v650_v1 = vmax.f32 %v600_v61, 0.0  ;;  %v603_v2 = vadd.f32 %v5346_v40, %v602_v63 }
 0x18b   : > { %v668_v7 = vmin.f32 %v652_v0, 6.0  ;;  %v653_v13 = vmax.f32 %v611_v5, 0.0  ;;  %v4724_v5 = vld [vmem:[#allocation8 + $0x58] sm:$0xff]  }
 0x18c   : > { %v666_v4 = vmin.f32 %v650_v1, 6.0  ;;  %v651_v6 = vmax.f32 %v603_v2, 0.0 }
 0x18d   : > { %v669_v24 = vmin.f32 %v653_v13, 6.0 }
 0x18e   : > { %v3868_v8 = vpack.c.bf16 %v666_v4, %v665_v3  ;;  %v667_v9 = vmin.f32 %v651_v6, 6.0  ;;  %v4151_v10 = vpop.f32.mrb[8].mxu1 }
 0x18f   : > { %v624_v11 = vadd.f32 %v4151_v10, %v5346_v40  ;;  %v615_v12 = vpop.f32.mrb[9].mxu1  ;;  %v5358_v18 = vld [vmem:[#allocation2 + $0xc] sm:$0xf] }
 0x190   : > { %3941 = vst [vmem:[#allocation2 + $0x18] sm:$0xff] %v3868_v8   ;;  %v3873_v14 = vpack.c.bf16 %v668_v7, %v667_v9  ;;  %v616_v15 = vadd.f32 %v5346_v40, %v615_v12  ;;  %v4152_v16 = vpop.f32.mrb[10].mxu1 }
 0x191   : > { %v618_v17 = vpop.f32.mrb[11].mxu1  ;;  %v5360_v19 = vld [vmem:[#allocation2 + $0x10] sm:$0xf]  ;;  %v656_v20 = vmax.f32 %v624_v11, 0.0  ;;  %v627_v27 = vadd.f32 %v4152_v16, %v5346_v40  ;;  %v5370_v33 = vld [vmem:[#allocation2 + $0x14] sm:$0xf]  ;;  %v765_v11 = vstv %s760_s5  ;;  %v761_v16 = vstv %s757_s30 }
 0x192   : > { %3942 = vst [vmem:[#allocation2 + $0x20] sm:$0xff] %v3873_v14   ;;  %v654_v21 = vmax.f32 %v616_v15, 0.0  ;;  %v619_v22 = vadd.f32 %v5346_v40, %v618_v17  ;;  %v5365_v23 = vcombine.low %v5358_v18, %v5360_v19  ;;  %s3472_s30 = scalar_lea.sflag [#allocation5], %s5301_s26 }
 0x193   : > { %v672_v29 = vmin.f32 %v656_v20, 6.0  ;;  %v657_v38 = vmax.f32 %v627_v27, 0.0 }
 0x194   : > { %v670_v25 = vmin.f32 %v654_v21, 6.0  ;;  %v655_v28 = vmax.f32 %v619_v22, 0.0  ;;  %4193 = vmatprep.mubr.bf16.mxu0 %v5365_v23  ;;  %v4728_v22 = vld [vmem:[#allocation8 + $0x60] sm:$0xff]  }
 0x195   : > { %v673_v52 = vmin.f32 %v657_v38, 6.0 }
 0x196   : > { %v3878_v30 = vpack.c.bf16 %v670_v25, %v669_v24  ;;  %v671_v31 = vmin.f32 %v655_v28, 6.0  ;;  %v4155_v32 = vpop.f32.mrb[12].mxu1 }
 0x197   : > { %v640_v34 = vadd.f32 %v4155_v32, %v5346_v40  ;;  %v631_v35 = vpop.f32.mrb[13].mxu1  ;;  %v5373_v36 = vld [vmem:[#allocation2 + $0x18] sm:$0xf]  ;;  %v5381_v46 = vld [vmem:[#allocation2 + $0x1c] sm:$0xf] }
 0x198   : > { %3943 = vst [vmem:[#allocation2 + $0x28] sm:$0xff] %v3878_v30   ;;  %v3883_v39 = vpack.c.bf16 %v672_v29, %v671_v31  ;;  %v632_v41 = vadd.f32 %v5346_v40, %v631_v35  ;;  %v4156_v42 = vpop.f32.mrb[14].mxu1  ;;  %v5379_v43 = vcombine.low %v5370_v33, %v5373_v36 }
 0x199   : > { %v634_v45 = vpop.f32.mrb[15].mxu1  ;;  %v5383_v47 = vld [vmem:[#allocation2 + $0x20] sm:$0xf]  ;;  %v660_v48 = vmax.f32 %v640_v34, 0.0  ;;  %v643_v54 = vadd.f32 %v4156_v42, %v5346_v40  ;;  %v879_v62 = vld [vmem:[#allocation2 + $0x24] sm:$0xf] }
 0x19a   : > { %3944 = vst [vmem:[#allocation2 + $0x30] sm:$0xff] %v3883_v39   ;;  %v658_v49 = vmax.f32 %v632_v41, 0.0  ;;  %v635_v50 = vadd.f32 %v5346_v40, %v634_v45  ;;  %4194 = vmatmul.mubr.bf16.vlgmr.msra.gmra.mrb[0].mxu0 %v5379_v43  ;;  %v5389_v51 = vcombine.low %v5381_v46, %v5383_v47  ;;  %v4733_v39 = vld [vmem:[#allocation8 + $0x68] sm:$0xff]  }
 0x19b   : > { %4210 = vmatpush3.bf16.msra.mxu0 %v5337_v26  ;;  %v676_v57 = vmin.f32 %v660_v48, 6.0  ;;  %v661_v0 = vmax.f32 %v643_v54, 0.0 }
 0x19c   : > { %v674_v53 = vmin.f32 %v658_v49, 6.0  ;;  %v659_v55 = vmax.f32 %v635_v50, 0.0  ;;  %4197 = vmatprep.mubr.bf16.mxu0 %v5389_v51  ;;  %4211 = vmatprep.subr.bf16.mxu0 %v4716_v44  ;;  %v4738_v49 = vld [vmem:[#allocation8 + $0x70] sm:$0xff]   ;;  %v3713_v50 = vcombine.low %v5360_v19, %v5370_v33 }
 0x19d   : > { %v677_v24 = vmin.f32 %v661_v0, 6.0 }
 0x19e   : > { %v3888_v58 = vpack.c.bf16 %v674_v53, %v673_v52  ;;  %v675_v59 = vmin.f32 %v659_v55, 6.0  ;;  %v4175_v60 = vpop.f32.mrb[16].mxu1  ;;  %v3714_v52 = vcombine.low %v5373_v36, %v5381_v46  ;;  %v3715_v53 = vcombine.low %v5383_v47, %v879_v62 }
 0x19f   : > { %v741_v26 = vadd.f32 %v4175_v60, %v5346_v40  ;;  %v732_v61 = vpop.f32.mrb[17].mxu1  ;;  %4212 = vmatpush3.bf16.msra.mxu0 %v4716_v44  ;;  %v5405_v63 = vld [vmem:[#allocation2 + $0x28] sm:$0xf]  ;;  %v5412_v9 = vld [vmem:[#allocation2 + $0x2c] sm:$0xf] }
 0x1a0   : > { %3945 = vst [vmem:[#allocation2 + $0x38] sm:$0xff] %v3888_v58   ;;  %v3893_v1 = vpack.c.bf16 %v676_v57, %v675_v59  ;;  %v733_v2 = vadd.f32 %v5346_v40, %v732_v61  ;;  %v4176_v3 = vpop.f32.mrb[18].mxu1  ;;  %v5409_v4 = vcombine.low %v879_v62, %v5405_v63  ;;  %4213 = vmatprep.subr.bf16.mxu0 %v4720_v56  ;;  %v1584_v57 = vshll.u32 %v3713_v50, 16  ;;  %v4742_v59 = vld [vmem:[#allocation8 + $0x78] sm:$0xff]  }
 0x1a1   : > { %v749_v6 = vmax.f32 %v741_v26, 0.0  ;;  %v744_v7 = vadd.f32 %v4176_v3, %v5346_v40  ;;  %v735_v8 = vpop.f32.mrb[19].mxu1  ;;  %v5414_v10 = vld [vmem:[#allocation2 + $0x30] sm:$0xf]  ;;  %v883_v31 = vld [vmem:[#allocation2 + $0x34] sm:$0xf] }
 0x1a2   : > { %3946 = vst [vmem:[#allocation2 + $0x40] sm:$0xff] %v3893_v1   ;;  %v747_v12 = vmax.f32 %v733_v2, 0.0  ;;  %v736_v13 = vadd.f32 %v5346_v40, %v735_v8  ;;  %4198 = vmatmul.mubr.bf16.gmra.mrb[4].mxu0 %v5409_v4  ;;  %v5420_v14 = vcombine.low %v5412_v9, %v5414_v10  ;;  %v1590_v60 = vshrl.u32 %v3714_v52, 16  ;;  %v4744_v1 = vld [vmem:[#allocation8 + $0x1c0] sm:$0xff]  }
 0x1a3   : > { %v753_v15 = vmin.f32 %v749_v6, 6.0  ;;  %v750_v17 = vmax.f32 %v744_v7, 0.0  ;;  %4214 = vmatpush3.bf16.msra.mxu0 %v4720_v56  ;;  %v1581_v56 = vshrl.u32 %v3713_v50, 16  ;;  %v1593_v26 = vshll.u32 %v3714_v52, 16 }
 0x1a4   : > { %v751_v20 = vmin.f32 %v747_v12, 6.0  ;;  %v748_v21 = vmax.f32 %v736_v13, 0.0  ;;  %4201 = vmatprep.mubr.bf16.mxu0 %v5420_v14  ;;  %4215 = vmatprep.subr.bf16.mxu0 %v4724_v5  ;;  %v1599_v61 = vshrl.u32 %v3715_v53, 16  ;;  %v1602_v0 = vshll.u32 %v3715_v53, 16 }
 0x1a5   : > { %v766_v25 = vmul.f32 %v765_v11, %v753_v15  ;;  %v754_v27 = vmin.f32 %v750_v17, 6.0  ;;  %v1583_v47 = vrot.slane %v1581_v56, 3  ;;  %v1586_v62 = vrot.slane %v1584_v57, 4  ;;  %v4746_v17 = vld [vmem:[#allocation8 + $0x1c8] sm:$0xff]  }
 0x1a6   : > { %v762_v40 = vmul.f32 %v761_v16, %v751_v20  ;;  %v752_v28 = vmin.f32 %v748_v21, 6.0  ;;  %v1592_v3 = vrot.slane %v1590_v60, 3  ;;  %v3716_v6 = vcombine.low %v5405_v63, %v5412_v9  ;;  %v1525_v56 = vld [vmem:[#allocation2] sm:$0x8] }
 0x1a7   : > { %v3898_v29 = vpack.c.bf16 %v766_v25, %v677_v24  ;;  %v767_v30 = vmul.f32 %v765_v11, %v754_v27  ;;  %4216 = vmatpush3.bf16.msra.mxu0 %v4724_v5  ;;  %v5423_v32 = vld [vmem:[#allocation2 + $0x38] sm:$0xf]  ;;  %v5428_v42 = vld [vmem:[#allocation2 + $0x3c] sm:$0xf]  ;;  %v1595_v5 = vrot.slane %v1593_v26, 4  ;;  %v1601_v7 = vrot.slane %v1599_v61, 3 }
 0x1a8   : > { %v3824_v34 = vpack.c.bf16 %v762_v40, %v762_v40  ;;  %v763_v35 = vmul.f32 %v761_v16, %v752_v28  ;;  %v5426_v38 = vcombine.low %v883_v31, %v5423_v32  ;;  %4217 = vmatprep.subr.bf16.mxu0 %v4728_v22  ;;  %v3717_v8 = vcombine.low %v5414_v10, %v883_v31  ;;  %v4747_v40 = vld [vmem:[#allocation8 + $0x8] sm:$0xff]  }
 0x1a9   : > { %3947 = vst [vmem:[#allocation2 + $0x48] sm:$0xff] %v3898_v29   ;;  %v3843_v41 = vpack.c.bf16 %v767_v30, %v767_v30  ;;  %v5430_v44 = vld [vmem:[#allocation2 + $0x40] sm:$0xf]  ;;  %v904_v54 = vld [vmem:[#allocation2 + $0x44] sm:$0xf]  ;;  %v1604_v13 = vrot.slane %v1602_v0, 4  ;;  %v1596_v24 = vor.u32 %v1595_v5, %v1592_v3  ;;  %v3718_v28 = vcombine.low %v5423_v32, %v5428_v42 }
 0x1aa   : > { %788 = vst [vmem:[#allocation2 + $0x4] sm:$0xf] %v3824_v34  ;;  %v3825_v45 = vpack.c.bf16 %v763_v35, %v763_v35  ;;  %4202 = vmatmul.mubr.bf16.gmra.mrb[8].mxu0 %v5426_v38  ;;  %v5435_v48 = vcombine.low %v5428_v42, %v5430_v44  ;;  %v1608_v20 = vshrl.u32 %v3716_v6, 16  ;;  %v1611_v21 = vshll.u32 %v3716_v6, 16  ;;  %v4748_v30 = vld [vmem:[#allocation8 + $0x1d0] sm:$0xff]   ;;  %v4753_v0 = vld [vmem:[#allocation8 + $0x20] sm:$0xff]  }
 0x1ab   : > { %870 = vst [vmem:[#allocation2 + $0x50] sm:$0xf] %v3843_v41  ;;  %4218 = vmatpush3.bf16.msra.mxu0 %v4728_v22  ;;  %v5456_v22 = vor.u32 %v1586_v62, %v1583_v47  ;;  %v1617_v25 = vshrl.u32 %v3717_v8, 16  ;;  %v1620_v63 = vshll.u32 %v3717_v8, 16  ;;  %v1605_v10 = vor.u32 %v1604_v13, %v1601_v7  ;;  %v4749_v32 = vld [vmem:[#allocation8 + $0x10] sm:$0xff]   ;;  %v4750_v41 = vld [vmem:[#allocation8 + $0x1d8] sm:$0xff]  }
 0x1ac   : > { %789 = vst [vmem:[#allocation2 + $0x8] sm:$0xf] %v3825_v45  ;;  %4205 = vmatprep.mubr.bf16.mxu0 %v5435_v48  ;;  %4219 = vmatprep.subr.bf16.mxu0 %v4733_v39  ;;  %v1613_v31 = vrot.slane %v1611_v21, 4  ;;  %v3719_v34 = vcombine.low %v5430_v44, %v904_v54  ;;  %v1626_v42 = vshrl.u32 %v3718_v28, 16  ;;  %v1629_v45 = vshll.u32 %v3718_v28, 16  ;;  %v4756_v6 = vld [vmem:[#allocation8 + $0x1f0] sm:$0xff]  }
 0x1ad   : > { %v5466_v29 = vsel %vm1571_vm6, %v5456_v22, %v1596_v24  ;;  %v1619_v35 = vrot.slane %v1617_v25, 3  ;;  %v5503_v13 = vld [vmem:[#allocation2 + $0x14] sm:$0xf]  ;;  %v5509_v28 = vld [vmem:[#allocation2 + $0x20] sm:$0xf] }
 0x1ae   : > { %v1635_v50 = vshrl.u32 %v3719_v34, 16  ;;  %v1638_v52 = vshll.u32 %v3719_v34, 16  ;;  %v1631_v60 = vrot.slane %v1629_v45, 4  ;;  %v1269_v34 = vld [vmem:[#allocation2 + $0x1c] sm:$0xf] }
 0x1af   : > { %4220 = vmatpush3.bf16.msra.mxu0 %v4733_v39  ;;  %v1622_v39 = vrot.slane %v1620_v63, 4  ;;  %v1512_v45 = vld [vmem:[%s6062_s8 + $0x18] sm:$0xff] }
 0x1b0   : > { %v5443_v55 = vld [vmem:[#allocation2 + $0x48] sm:$0xf]  ;;  %4221 = vmatprep.subr.bf16.mxu0 %v4738_v49  ;;  %v1637_v26 = vrot.slane %v1635_v50, 3  ;;  %v1640_v61 = vrot.slane %v1638_v52, 4 }
 0x1b1   : > { %v3678_v58 = vcombine.low %v904_v54, %v5443_v55  ;;  %v5446_v19 = vld [vmem:[#allocation2 + $0x4] sm:$0xf]  ;;  %v1623_v53 = vor.u32 %v1622_v39, %v1619_v35  ;;  %v4751_v54 = vld [vmem:[#allocation8 + $0x18] sm:$0xff]   ;;  %v3697_v35 = vcombine.low %v1269_v34, %v5509_v28  ;;  %v4772_v52 = vld [vmem:[#allocation8 + $0x150] sm:$0xff]  }
 0x1b2   : > { %v5521_v39 = vld [vmem:[#allocation2 + $0x24] sm:$0xf] }
 0x1b3   : > { %4206 = vmatmul.mubr.bf16.gmra.mrb[12].mxu0 %v3678_v58  ;;  %v5448_v33 = vld [vmem:[#allocation2 + $0x8] sm:$0xf]  ;;  %v4752_v58 = vld [vmem:[#allocation8 + $0x1e0] sm:$0xff]  }
 0x1b4   : > { %v1542_v36 = vld [vmem:[#allocation2 + $0x8] sm:$0x8]  ;;  %4222 = vmatpush3.bf16.msra.mxu0 %v4738_v49  ;;  %v3687_v46 = vcombine.low %v5446_v19, %v5448_v33 }
 0x1b5   : > { %4223 = vmatprep.subr.bf16.mxu0 %v4742_v59  ;;  %v3712_v2 = vcombine.low %v1542_v36, %v5358_v18 }
 0x1b6   : > { %4225 = vmatprep.mubr.bf16.mxu0 %v3687_v46 }
 0x1b7   : > { %v1573_v11 = vshrl.u32 %v3712_v2, 16  ;;  %v1576_v12 = vshll.u32 %v3712_v2, 16 }
 0x1b8   : > { %4224 = vmatpush3.bf16.msra.mxu0 %v4742_v59  ;;  %v1628_v59 = vrot.slane %v1626_v42, 3 }
 0x1b9   : > { %4241 = vmatprep.subr.bf16.mxu0 %v4744_v1  ;;  %v1575_v15 = vrot.slane %v1573_v11, 3  ;;  %v1578_v16 = vrot.slane %v1576_v12, 4  ;;  %v5501_v11 = vld [vmem:[#allocation2 + $0x18] sm:$0xf] }
 0x1ba   : > { %v5490_v47 = vor.u32 %v1631_v60, %v1628_v59  ;;  %v5545_v59 = vld [vmem:[#allocation2 + $0x34] sm:$0xf]  ;;  %v4775_v60 = vld [vmem:[#allocation8 + $0x190] sm:$0xff]  }
 0x1bb   : > { %4226 = vmatmul.mubr.bf16.vlgmr.msra.gmra.mrb[0].mxu0 %v5365_v23  ;;  %v1579_v9 = vor.u32 %v1578_v16, %v1575_v15  ;;  %v1610_v23 = vrot.slane %v1608_v20, 3  ;;  %v4761_v15 = vld [vmem:[#allocation8 + $0x30] sm:$0xff]   ;;  %v3696_v20 = vcombine.low %v5503_v13, %v5501_v11 }
 0x1bc   : > { %4229 = vmatprep.mubr.bf16.mxu0 %v5379_v43  ;;  %4242 = vmatpush3.bf16.msra.mxu0 %v4744_v1  ;;  %v5471_v43 = vsel %vm1571_vm6, %v1596_v24, %v1605_v10  ;;  %v1641_v1 = vor.u32 %v1640_v61, %v1637_v26  ;;  %v5496_v5 = vsel %vm1571_vm6, %v1623_v53, %v5490_v47  ;;  %v4762_v24 = vld [vmem:[#allocation8 + $0x1f8] sm:$0xff]   ;;  %v1513_v26 = vld [vmem:[%s6062_s8 + $0x20] sm:$0xff] }
 0x1bd   : > { %v1588_v27 = vsel %vm1571_vm6, %v1579_v9, %v5456_v22  ;;  %4243 = vmatprep.subr.bf16.mxu0 %v4746_v17  ;;  %v1614_v49 = vor.u32 %v1613_v31, %v1610_v23  ;;  %v4763_v9 = vld [vmem:[#allocation8 + $0x38] sm:$0xff]   ;;  %v5515_v23 = vld [vmem:[#allocation2 + $0x28] sm:$0xf]  ;;  %v1509_v31 = vld [vmem:[%s6062_s8] sm:$0xff] }
 0x1be   : > { %4289 = vmatprep.mubr.bf16.mxu1 %v1588_v27  ;;  %v4764_v27 = vld [vmem:[#allocation8 + $0x140] sm:$0xff]   ;;  %v3698_v42 = vcombine.low %v5521_v39, %v5515_v23  ;;  %v4777_v61 = vld [vmem:[#allocation8 + $0x198] sm:$0xff]  }
 0x1bf   : > { %4290 = vmatmul.mubr.bf16.vlgmr.msra.gmra.mrb[20].mxu1 %v5466_v29  ;;  %v5480_v57 = vsel %vm1571_vm6, %v1605_v10, %v1614_v49 }
 0x1c0   : > { %4293 = vmatprep.mubr.bf16.mxu1 %v5471_v43  ;;  %4306 = vmatpush3.bf16.msra.mxu1 %v5340_v37  ;;  %v3720_v37 = vcombine.low %v5443_v55, %v5443_v55  ;;  %v3729_v55 = vcombine.low %v1525_v56, %v5446_v19  ;;  %v4755_v19 = vld [vmem:[#allocation8 + $0x28] sm:$0xff]   ;;  %v5541_v56 = vld [vmem:[#allocation2 + $0x2c] sm:$0xf] }
 0x1c1   : > { %4244 = vmatpush3.bf16.msra.mxu0 %v4746_v17  ;;  %4307 = vmatprep.subr.bf16.mxu1 %v4747_v40 }
 0x1c2   : > { %4245 = vmatprep.subr.bf16.mxu0 %v4748_v30  ;;  %v1644_v36 = vshrl.u32 %v3720_v37, 16  ;;  %v1647_v46 = vshll.u32 %v3720_v37, 16  ;;  %v1811_v2 = vshrl.u32 %v3729_v55, 16  ;;  %v1814_v3 = vshll.u32 %v3729_v55, 16  ;;  %v5536_v37 = vld [vmem:[#allocation2 + $0x38] sm:$0xf] }
 0x1c3   : > { %4230 = vmatmul.mubr.bf16.gmra.mrb[4].mxu0 %v5389_v51  ;;  %v3730_v51 = vcombine.low %v5448_v33, %v5358_v18  ;;  %v4754_v18 = vld [vmem:[#allocation8 + $0x1e8] sm:$0xff]   ;;  %v3731_v55 = vcombine.low %v5430_v44, %v5430_v44  ;;  %v5564_v44 = vld [vmem:[#allocation2 + $0x48] sm:$0xf] }
 0x1c4   : > { %4308 = vmatpush3.bf16.msra.mxu1 %v4747_v40  ;;  %4233 = vmatprep.mubr.bf16.mxu0 %v5409_v4  ;;  %v5486_v4 = vsel %vm1571_vm6, %v1614_v49, %v1623_v53  ;;  %v1646_v7 = vrot.slane %v1644_v36, 3  ;;  %v1649_v8 = vrot.slane %v1647_v46, 4  ;;  %v1813_v16 = vrot.slane %v1811_v2, 3  ;;  %v4769_v49 = vld [vmem:[#allocation8 + $0x188] sm:$0xff]   ;;  %v5530_v53 = vld [vmem:[#allocation2 + $0x30] sm:$0xf] }
 0x1c5   : > { %4246 = vmatpush3.bf16.msra.mxu0 %v4748_v30  ;;  %4309 = vmatprep.subr.bf16.mxu1 %v4749_v32  ;;  %v1819_v33 = vshrl.u32 %v3730_v51, 16  ;;  %v1822_v62 = vshll.u32 %v3730_v51, 16  ;;  %v1816_v17 = vrot.slane %v1814_v3, 4  ;;  %v5040_v40 = vmov 0   ;;  %v4776_v51 = vld [vmem:[#allocation8 + $0x158] sm:$0xff]   ;;  %v4780_v36 = vld [vmem:[#allocation8 + $0x160] sm:$0xff]  }
 0x1c6   : > { %4247 = vmatprep.subr.bf16.mxu0 %v4750_v41  ;;  %v1650_v21 = vor.u32 %v1649_v8, %v1646_v7  ;;  %4682 = vset.pattern.permute.xlu1 %v5040_v40  ;;  %v5554_v46 = vld [vmem:[#allocation2 + $0xc] sm:$0xff]   ;;  %v5572_v3 = vld [vmem:[#allocation2 + $0x3c] sm:$0xf]  ;;  %v4784_v7 = vld [vmem:[#allocation8 + $0x168] sm:$0xff]  }
 0x1c7   : > { %4294 = vmatmul.mubr.bf16.gmra.mrb[24].mxu1 %v5480_v57  ;;  %v1824_v12 = vrot.slane %v1822_v62, 4  ;;  %v1817_v63 = vor.u32 %v1816_v17, %v1813_v16  ;;  %4681 = vset.pattern.permute.xlu0 %v5040_v40  ;;  %v1516_v62 = vld [vmem:[%s6062_s8 + $0x38] sm:$0xff]  ;;  %v1515_v2 = vld [vmem:[%s6062_s8 + $0x30] sm:$0xff]  ;;  %v2492_v8 = vshll.u32 %v5554_v46, 16  ;;  %v1518_v16 = vld [vmem:[%s6062_s8 + $0x48] sm:$0xff]  ;;  %v3743_v40 = vcombine.low %v5515_v23, %v5541_v56 }
 0x1c8   : > { %4297 = vmatprep.mubr.bf16.mxu1 %v5486_v4  ;;  %4310 = vmatpush3.bf16.msra.mxu1 %v4749_v32  ;;  %v1651_v10 = vsel %vm1571_vm6, %v1641_v1, %v1650_v21  ;;  %v4767_v32 = vld [vmem:[#allocation8 + $0x180] sm:$0xff]   ;;  %v3742_v21 = vcombine.low %v5509_v28, %v5521_v39  ;;  %v5601_v39 = vld [vmem:[#allocation2 + $0x24] sm:$0xff]  }
 0x1c9   : > { %4248 = vmatpush3.bf16.msra.mxu0 %v4750_v41  ;;  %4311 = vmatprep.subr.bf16.mxu1 %v4751_v54  ;;  %v4768_v41 = vld [vmem:[#allocation8 + $0x148] sm:$0xff]  }
 0x1ca   : > { %4249 = vmatprep.subr.bf16.mxu0 %v4752_v58  ;;  %2265 = vperm.xlu0 %4681, %v1509_v31   ;;  %v1517_v31 = vld [vmem:[%s6062_s8 + $0x40] sm:$0xff]  ;;  %v2032_v23 = vshrl.u32 %v3742_v21, 16 }
 0x1cb   : > { %4234 = vmatmul.mubr.bf16.gmra.mrb[8].mxu0 %v5420_v14  ;;  %v1642_v14 = vsel %vm1571_vm6, %v5490_v47, %v1641_v1  ;;  %v5566_v1 = vld [vmem:[#allocation2 + $0x14] sm:$0xff]  }
 0x1cc   : > { %4312 = vmatpush3.bf16.msra.mxu1 %v4751_v54  ;;  %4237 = vmatprep.mubr.bf16.mxu0 %v5426_v38  ;;  %v1821_v38 = vrot.slane %v1819_v33, 3  ;;  %v1510_v54 = vld [vmem:[%s6062_s8 + $0x8] sm:$0xff]  ;;  %v5558_v33 = vld [vmem:[#allocation2 + $0x40] sm:$0xf] }
 0x1cd   : > { %4250 = vmatpush3.bf16.msra.mxu0 %v4752_v58  ;;  %4313 = vmatprep.subr.bf16.mxu1 %v4753_v0  ;;  %v3699_v58 = vcombine.low %v5541_v56, %v5530_v53  ;;  %v2041_v56 = vshrl.u32 %v3743_v40, 16 }
 0x1ce   : > { %4251 = vmatprep.subr.bf16.mxu0 %v4754_v18  ;;  %v1825_v25 = vor.u32 %v1824_v12, %v1821_v38  ;;  %2270 = vperm.xlu0 %4681, %v1510_v54   ;;  %v4793_v54 = vld [vmem:[#allocation8 + $0x178] sm:$0xff]  }
 0x1cf   : > { %4298 = vmatmul.mubr.bf16.gmra.mrb[28].mxu1 %v5496_v5 }
 0x1d0   : > { %4301 = vmatprep.mubr.bf16.mxu1 %v1642_v14  ;;  %4314 = vmatpush3.bf16.msra.mxu1 %v4753_v0  ;;  %v1826_v30 = vsel %vm1571_vm6, %v1817_v63, %v1825_v25  ;;  %v1827_v50 = vsel %vm1571_vm6, %v1825_v25, %v5456_v22  ;;  %v1514_v22 = vld [vmem:[%s6062_s8 + $0x28] sm:$0xff]  ;;  %v1985_v0 = vld [vmem:[#allocation2 + $0x10] sm:$0x8]  ;;  %v1829_v14 = vshrl.u32 %v3731_v55, 16  ;;  %v5587_v63 = vrot.slane %v2492_v8, 1  ;;  %v5637_v8 = vld [vmem:[#allocation2 + $0x34] sm:$0xff]  }
 0x1d1   : > { %4252 = vmatpush3.bf16.msra.mxu0 %v4754_v18  ;;  %4315 = vmatprep.subr.bf16.mxu1 %v4755_v19  ;;  %v3741_v18 = vcombine.low %v5501_v11, %v1269_v34  ;;  %v1832_v11 = vshll.u32 %v3731_v55, 16  ;;  %v4789_v25 = vld [vmem:[#allocation8 + $0x170] sm:$0xff]   ;;  %v2490_v34 = vshrl.u32 %v5554_v46, 16  ;;  %v3744_v55 = vcombine.low %v5530_v53, %v5545_v59  ;;  %v4794_v46 = vld [vmem:[#allocation8 + $0x1b8] sm:$0xff]  }
 0x1d2   : > { %4253 = vmatprep.subr.bf16.mxu0 %v4756_v6  ;;  %2285 = vperm.xlu0 %4681, %v1513_v26   ;;  %v1519_v26 = vld [vmem:[%s6062_s8 + $0x50] sm:$0xff] }
 0x1d3   : > { %4238 = vmatmul.mubr.bf16.gmra.mrb[12].mxu0 %v5435_v48  ;;  %v1511_v48 = vld [vmem:[%s6062_s8 + $0x10] sm:$0xff]  ;;  %v2023_v38 = vshrl.u32 %v3741_v18, 16  ;;  %v2026_v12 = vshll.u32 %v3741_v18, 16 }
 0x1d4   : > { %4316 = vmatpush3.bf16.msra.mxu1 %v4755_v19  ;;  %4257 = vmatprep.mubr.bf16.mxu0 %v3696_v20  ;;  %v4783_v19 = vld [vmem:[#allocation8 + $0x1a0] sm:$0xff]  }
 0x1d5   : > { %4254 = vmatpush3.bf16.msra.mxu0 %v4756_v6  ;;  %4317 = vmatprep.subr.bf16.mxu1 %v4761_v15  ;;  %v3701_v6 = vcombine.low %v5572_v3, %v5558_v33  ;;  %v2025_v28 = vrot.slane %v2023_v38, 3  ;;  %v2053_v38 = vshll.u32 %v3744_v55, 16 }
 0x1d6   : > { %4255 = vmatprep.subr.bf16.mxu0 %v4762_v24  ;;  %2275 = vperm.xlu1 %4682, %v1511_v48   ;;  %v2028_v48 = vrot.slane %v2026_v12, 4 }
 0x1d7   : > { %4302 = vmatmul.mubr.bf16.gmra.mrb[32].mxu1 %v1651_v10  ;;  %2295 = vperm.xlu0 %4681, %v1515_v2   ;;  %v1834_v10 = vrot.slane %v1832_v11, 4  ;;  %v2050_v11 = vshrl.u32 %v3744_v55, 16 }
 0x1d8   : > { %4318 = vmatpush3.bf16.msra.mxu1 %v4761_v15  ;;  %4321 = vmatprep.mubr.bf16.mxu1 %v1826_v30  ;;  %v2497_v15 = vshll.u32 %v5566_v1, 16  ;;  %v5594_v30 = vld [vmem:[#allocation2 + $0x50] sm:$0xf] }
 0x1d9   : > { %4256 = vmatpush3.bf16.msra.mxu0 %v4762_v24  ;;  %4319 = vmatprep.subr.bf16.mxu1 %v4763_v9  ;;  %v4785_v24 = vld [vmem:[#allocation8 + $0x1a8] sm:$0xff]  }
 0x1da   : > { %4369 = vmatprep.subr.bf16.mxu0 %v4764_v27  ;;  %2280 = vperm.xlu1 %4682, %v1512_v45  }
 0x1db   : > { %2305 = vperm.xlu0 %4681, %v1517_v31   ;;  %v2517_v31 = vshrl.u32 %v5601_v39, 16 }
 0x1dc   : > { %4258 = vmatmul.mubr.bf16.vlgmr.msra.gmra.mrb[0].mxu0 %v3697_v35  ;;  %4320 = vmatpush3.bf16.msra.mxu1 %v4763_v9  ;;  %v1831_v9 = vrot.slane %v1829_v14, 3  ;;  %v2499_v35 = vrot.slane %v2497_v15, 1  ;;  %v1521_v14 = vld [vmem:[%s6062_s8 + $0x60] sm:$0xff]  ;;  %v5642_v15 = vld [vmem:[#allocation8 + $0x200] sm:$0xff]  }
 0x1dd   : > { %4261 = vmatprep.mubr.bf16.mxu0 %v3698_v42  ;;  %4370 = vmatpush3.bf16.msra.mxu0 %v4764_v27  ;;  %v5589_v27 = vld [vmem:[#allocation2 + $0x1c] sm:$0xff]  }
 0x1de   : > { %4337 = vmatprep.subr.bf16.mxu1 %v4767_v32  ;;  %4371 = vmatprep.subr.bf16.mxu0 %v4768_v41 }
 0x1df   : > { %4322 = vmatmul.mubr.bf16.vlgmr.msra.gmra.mrb[20].mxu1 %v1827_v50  ;;  %2290 = vperm.xlu1 %4682, %v1514_v22   ;;  %v1835_v50 = vor.u32 %v1834_v10, %v1831_v9  ;;  %v2505_v22 = vshll.u32 %v5589_v27, 16  ;;  %v2529_v10 = vshll.u32 %v5637_v8, 16 }
 0x1e0   : > { %4325 = vmatprep.mubr.bf16.mxu1 %v5466_v29  ;;  %4338 = vmatpush3.bf16.msra.mxu1 %v4767_v32  ;;  %v3700_v29 = vcombine.low %v5545_v59, %v5536_v37  ;;  %v2035_v32 = vshll.u32 %v3742_v21, 16 }
 0x1e1   : > { %4372 = vmatpush3.bf16.msra.mxu0 %v4768_v41  ;;  %4339 = vmatprep.subr.bf16.mxu1 %v4769_v49  ;;  %v5606_v41 = vld [vmem:[#allocation2 + $0x4c] sm:$0xf]  ;;  %v1836_v2 = vsel %vm1571_vm6, %v5490_v47, %v1835_v50  ;;  %v2509_v47 = vshrl.u32 %v5589_v27, 16  ;;  %v1524_v27 = vld [vmem:[%s6062_s8 + $0x78] sm:$0xff] }
 0x1e2   : > { %4373 = vmatprep.subr.bf16.mxu0 %v4772_v52  ;;  %v2037_v18 = vrot.slane %v2035_v32, 4  ;;  %2315 = vperm.xlu0 %4681, %v1519_v26   ;;  %v2376_v50 = vld [vmem:[%s6063_s27 + $0x8] sm:$0xff]  ;;  %s4935_s27 = sshll.u32 %s5041_s4, 4  ;;  %s4936_s27 = int_to_ptr.vmem [resolvable:$false] %s4935_s27 }
 0x1e3   : > { %2300 = vperm.xlu1 %4682, %v1516_v62   ;;  %v3745_v62 = vcombine.low %v5536_v37, %v5572_v3  ;;  %v1522_v37 = vld [vmem:[%s6062_s8 + $0x68] sm:$0xff]  ;;  %s4937_s16 = scalar_lea.vmem %s4936_s27, 2048  ;;  %p4938_p12 = scmp.lt.s32.totalorder %s5956_s20, %s4936_s27 }
 0x1e4   : > { %4262 = vmatmul.mubr.bf16.gmra.mrb[4].mxu0 %v3699_v58  ;;  %4340 = vmatpush3.bf16.msra.mxu1 %v4769_v49  ;;  %v2495_v49 = vor.u32 %v5587_v63, %v2490_v34  ;;  %v2044_v58 = vshll.u32 %v3743_v40, 16  ;;  %p4939_p1 = scmp.lt.s32.totalorder %s4937_s16, %s4931_s7 }
 0x1e5   : > { %4265 = vmatprep.mubr.bf16.mxu0 %v3700_v29  ;;  %4374 = vmatpush3.bf16.msra.mxu0 %v4772_v52  ;;  %v4792_v52 = vld [vmem:[#allocation8 + $0x1b0] sm:$0xff]   ;;  %v2513_v29 = vshll.u32 %v5601_v39, 16  ;;  %v2062_v21 = vshll.u32 %v3745_v62, 16  ;;  %v1523_v39 = vld [vmem:[%s6062_s8 + $0x70] sm:$0xff] }
 0x1e6   : > { %4341 = vmatprep.subr.bf16.mxu1 %v4775_v60  ;;  %4375 = vmatprep.subr.bf16.mxu0 %v4776_v51  ;;  %p4940_p2 = por %p4939_p1, %p4938_p12 }
 0x1e7   : > { %4326 = vmatmul.mubr.bf16.gmra.mrb[24].mxu1 %v5471_v43  ;;  %v3740_v43 = vcombine.low %v1985_v0, %v5503_v13  ;;  %2310 = vperm.xlu1 %4682, %v1518_v16   ;;  %v2501_v0 = vshrl.u32 %v5566_v1, 16  ;;  %v2043_v1 = vrot.slane %v2041_v56, 3  ;;  %v2515_v3 = vrot.slane %v2513_v29, 1  ;;  %v4799_v16 = vld [vmem:[#allocation8 + $0x88] sm:$0xff]  }
 0x1e8   : > { %4329 = vmatprep.mubr.bf16.mxu1 %v5480_v57  ;;  %4342 = vmatpush3.bf16.msra.mxu1 %v4775_v60  ;;  %v5576_v57 = vld [vmem:[#allocation2 + $0x44] sm:$0xf]  ;;  %v5612_v60 = vor.u32 %v2028_v48, %v2025_v28  ;;  %v5660_v28 = vcombine.low %v5564_v44, %v5606_v41  ;;  %p4941_p5 = pnand %p4940_p2, %p4934_p7 }
 0x1e9   : > { %4376 = vmatpush3.bf16.msra.mxu0 %v4776_v51  ;;  %4343 = vmatprep.subr.bf16.mxu1 %v4777_v61  ;;  %v3702_v13 = vcombine.low %v5576_v57, %v5564_v44  ;;  %v2015_v17 = vshrl.u32 %v3740_v43, 16  ;;  %v2018_v20 = vshll.u32 %v3740_v43, 16  ;;  %v5615_v51 = vsel %vm2488_vm7, %v2495_v49, %v2499_v35  ;;  %v5663_v48 = vld [vmem:[#allocation8 + $0x208] sm:$0xff]  }
 0x1ea   : > { %4377 = vmatprep.subr.bf16.mxu0 %v4780_v36  ;;  %v2507_v43 = vrot.slane %v2505_v22, 1  ;;  %v2503_v53 = vor.u32 %v2501_v0, %v2499_v35  ;;  %2325 = vperm.xlu0 %4681, %v1521_v14   ;;  %v3746_v40 = vcombine.low %v5558_v33, %v5576_v57  ;;  %v2052_v33 = vrot.slane %v2050_v11, 3  ;;  %v5677_v49 = vld [vmem:[#allocation2 + $0x44] sm:$0xff]   ;;  %v5711_v14 = vld [vmem:[#allocation2 + $0x34] sm:$0xff]  }
 0x1eb   : > { %v2017_v42 = vrot.slane %v2015_v17, 3  ;;  %v2020_v45 = vrot.slane %v2018_v20, 4  ;;  %v2059_v20 = vshrl.u32 %v3745_v62, 16  ;;  %v2055_v57 = vrot.slane %v2053_v38, 4  ;;  %v2375_v62 = vld [vmem:[%s6064_s19] sm:$0xff] }
 0x1ec   : > { %4266 = vmatmul.mubr.bf16.gmra.mrb[8].mxu0 %v3701_v6  ;;  %4344 = vmatpush3.bf16.msra.mxu1 %v4777_v61  ;;  %v2034_v61 = vrot.slane %v2032_v23, 3  ;;  %v5629_v6 = vld [vmem:[#allocation2 + $0x2c] sm:$0xff]   ;;  %v2511_v12 = vor.u32 %v2509_v47, %v2507_v43  ;;  %v5669_v23 = vld [vmem:[#allocation2 + $0x3c] sm:$0xff]   ;;  %v2519_v32 = vor.u32 %v2517_v31, %v2515_v3  ;;  %v2077_v26 = vshrl.u32 %v5660_v28, 16 }
 0x1ed   : > { %4269 = vmatprep.mubr.bf16.mxu0 %v3702_v13  ;;  %4378 = vmatpush3.bf16.msra.mxu0 %v4780_v36  ;;  %v2021_v36 = vor.u32 %v2020_v45, %v2017_v42  ;;  %v2521_v17 = vshll.u32 %v5629_v6, 16  ;;  %v2064_v42 = vrot.slane %v2062_v21, 4  ;;  %v2525_v45 = vshrl.u32 %v5629_v6, 16  ;;  %v5730_v31 = vld [vmem:[#allocation2 + $0x3c] sm:$0xff]  }
 0x1ee   : > { %4345 = vmatprep.subr.bf16.mxu1 %v4783_v19  ;;  %4379 = vmatprep.subr.bf16.mxu0 %v4784_v7  ;;  %v2038_v13 = vor.u32 %v2037_v18, %v2034_v61  ;;  %v5650_v9 = vsel %vm2488_vm7, %v2511_v12, %v2515_v3  ;;  %v2056_v56 = vor.u32 %v2055_v57, %v2052_v33  ;;  %v2537_v29 = vshll.u32 %v5669_v23, 16  ;;  %v5697_v18 = vld [vmem:[#allocation2 + $0x4] sm:$0xff]  }
 0x1ef   : > { %4330 = vmatmul.mubr.bf16.gmra.mrb[28].mxu1 %v5486_v4  ;;  %v1520_v4 = vld [vmem:[%s6062_s8 + $0x58] sm:$0xff]  ;;  %v2030_v59 = vsel %vm1571_vm6, %v2021_v36, %v5612_v60  ;;  %v2523_v35 = vrot.slane %v2521_v17, 1  ;;  %2335 = vperm.xlu0 %4681, %v1523_v39   ;;  %v2080_v61 = vshll.u32 %v5660_v28, 16  ;;  %v2079_v47 = vrot.slane %v2077_v26, 3  ;;  %v2380_v33 = vld [vmem:[%s6064_s19 + $0x28] sm:$0xff]  ;;  %v5740_v57 = vld [vmem:[#allocation8 + $0x228] sm:$0xff]  }
 0x1f0   : > { %4333 = vmatprep.mubr.bf16.mxu1 %v5496_v5  ;;  %4346 = vmatpush3.bf16.msra.mxu1 %v4783_v19  ;;  %v3703_v5 = vcombine.low %v5606_v41, %v5594_v30  ;;  %v4796_v19 = vld [vmem:[#allocation8 + $0x80] sm:$0xff]   ;;  %v2039_v34 = vsel %vm1571_vm6, %v5612_v60, %v2038_v13  ;;  %v2061_v41 = vrot.slane %v2059_v20, 3  ;;  %v4805_v60 = vld [vmem:[#allocation8 + $0x98] sm:$0xff]   ;;  %v2541_v11 = vshrl.u32 %v5669_v23, 16 }
 0x1f1   : > { %4380 = vmatpush3.bf16.msra.mxu0 %v4784_v7  ;;  %4347 = vmatprep.subr.bf16.mxu1 %v4785_v24  ;;  %v2046_v7 = vrot.slane %v2044_v58, 4  ;;  %v2527_v22 = vor.u32 %v2525_v45, %v2523_v35  ;;  %v5683_v58 = vld [vmem:[#allocation8 + $0x210] sm:$0xff]   ;;  %v5689_v55 = vsel %vm2488_vm7, %v2519_v32, %v2523_v35  ;;  %v2082_v3 = vrot.slane %v2080_v61, 4 }
 0x1f2   : > { %4381 = vmatprep.subr.bf16.mxu0 %v4789_v25  ;;  %2320 = vperm.xlu1 %4682, %v1520_v4   ;;  %v4802_v4 = vld [vmem:[#allocation8 + $0x90] sm:$0xff]   ;;  %v2065_v0 = vor.u32 %v2064_v42, %v2061_v41  ;;  %v2721_v12 = vshll.u32 %v5697_v18, 16  ;;  %v2549_v23 = vshrl.u32 %v5677_v49, 16  ;;  %v2719_v42 = vshrl.u32 %v5697_v18, 16 }
 0x1f3   : > { %3194 = vperm.xlu0 %4681, %v2375_v62   ;;  %v2083_v28 = vor.u32 %v2082_v3, %v2079_v47  ;;  %v4814_v41 = vld [vmem:[#allocation8 + $0xb0] sm:$0xff]   ;;  %v2991_v26 = vshrl.u32 %v5711_v14, 16  ;;  %v2383_v3 = vld [vmem:[%s6064_s19 + $0x40] sm:$0xff] }
 0x1f4   : > { %4270 = vmatmul.mubr.bf16.gmra.mrb[12].mxu0 %v3703_v5  ;;  %4348 = vmatpush3.bf16.msra.mxu1 %v4785_v24  ;;  %v5646_v24 = vsel %vm2488_vm7, %v2503_v53, %v2507_v43  ;;  %v2531_v5 = vrot.slane %v2529_v10, 1  ;;  %v5705_v43 = vld [vmem:[#allocation8 + $0x218] sm:$0xff]   ;;  %v2539_v53 = vrot.slane %v2537_v29, 1  ;;  %v5725_v10 = vld [vmem:[#allocation8 + $0x220] sm:$0xff]  }
 0x1f5   : > { %4382 = vmatpush3.bf16.msra.mxu0 %v4789_v25  ;;  %4385 = vmatprep.mubr.bf16.mxu0 %v5615_v51  ;;  %v2047_v25 = vor.u32 %v2046_v7, %v2043_v1 }
 0x1f6   : > { %4349 = vmatprep.subr.bf16.mxu1 %v4792_v52  ;;  %4383 = vmatprep.subr.bf16.mxu0 %v4793_v54  ;;  %v5694_v36 = vsel %vm2488_vm7, %v2527_v22, %v2531_v5  ;;  %v5723_v21 = vor.u32 %v2541_v11, %v2539_v53  ;;  %v2379_v22 = vld [vmem:[%s6064_s19 + $0x20] sm:$0xff]  ;;  %v4823_v11 = vld [vmem:[#allocation2 + $0x54] ss:$0 sps:$4 sm:$0x11]  }
 0x1f7   : > { %4334 = vmatmul.mubr.bf16.gmra.mrb[32].mxu1 %v1836_v2  ;;  %2330 = vperm.xlu1 %4682, %v1522_v37   ;;  %v2048_v44 = vsel %vm1571_vm6, %v2038_v13, %v2047_v25  ;;  %v3748_v2 = vcombine.low %v5594_v30, %v5594_v30  ;;  %v2057_v6 = vsel %vm1571_vm6, %v2047_v25, %v2056_v56  ;;  %v2377_v13 = vld [vmem:[%s6064_s19 + $0x10] sm:$0xff] }
 0x1f8   : > { %4350 = vmatpush3.bf16.msra.mxu1 %v4792_v52  ;;  %4353 = vmatprep.mubr.bf16.mxu1 %v2030_v59  ;;  %v2068_v52 = vshrl.u32 %v3746_v40, 16  ;;  %v4808_v59 = vld [vmem:[#allocation8 + $0xa0] sm:$0xff]   ;;  %v2066_v37 = vsel %vm1571_vm6, %v2056_v56, %v2065_v0 }
 0x1f9   : > { %4384 = vmatpush3.bf16.msra.mxu0 %v4793_v54  ;;  %4351 = vmatprep.subr.bf16.mxu1 %v4794_v46  ;;  %v2071_v54 = vshll.u32 %v3746_v40, 16  ;;  %v2086_v17 = vshrl.u32 %v3748_v2, 16  ;;  %v2089_v20 = vshll.u32 %v3748_v2, 16 }
 0x1fa   : > { %4401 = vmatprep.subr.bf16.mxu0 %v4796_v19  ;;  %v2070_v1 = vrot.slane %v2068_v52, 3  ;;  %3204 = vperm.xlu0 %4681, %v2377_v13   ;;  %v2386_v13 = vld [vmem:[%s6064_s19 + $0x58] sm:$0xff] }
 0x1fb   : > { %2340 = vperm.xlu1 %4682, %v1524_v27   ;;  %v2073_v7 = vrot.slane %v2071_v54, 4  ;;  %v4811_v27 = vld [vmem:[#allocation8 + $0xa8] sm:$0xff]   ;;  %v2088_v39 = vrot.slane %v2086_v17, 3  ;;  %v2091_v45 = vrot.slane %v2089_v20, 4  ;;  %v2995_v54 = vshll.u32 %v5730_v31, 16  ;;  %v2385_v17 = vld [vmem:[%s6064_s19 + $0x50] sm:$0xff] }
 0x1fc   : > { %4352 = vmatpush3.bf16.msra.mxu1 %v4794_v46  ;;  %4386 = vmatmul.mubr.bf16.vlgmr.msra.gmra.mrb[16].mxu0 %v5646_v24  ;;  %v2545_v46 = vshll.u32 %v5677_v49, 16  ;;  %v4821_v49 = vld [vmem:[#allocation2 + $0x44] sm:$0xff]  }
 0x1fd   : > { %4389 = vmatprep.mubr.bf16.mxu0 %v5650_v9  ;;  %4402 = vmatpush3.bf16.msra.mxu0 %v4796_v19  ;;  %v2533_v19 = vshrl.u32 %v5637_v8, 16  ;;  %v2378_v8 = vld [vmem:[%s6064_s19 + $0x18] sm:$0xff]  ;;  %v2074_v25 = vor.u32 %v2073_v7, %v2070_v1  ;;  %v2092_v61 = vor.u32 %v2091_v45, %v2088_v39  ;;  %v2997_v2 = vrot.slane %v2995_v54, 1  ;;  %v5769_v1 = vld [vmem:[#allocation8 + $0x238] sm:$0xff]  }
 0x1fe   : > { %4465 = vmatprep.subr.bf16.mxu1 %v5642_v15  ;;  %4403 = vmatprep.subr.bf16.mxu0 %v4799_v16  ;;  %v2547_v38 = vrot.slane %v2545_v46, 1  ;;  %v4817_v46 = vld [vmem:[#allocation8 + $0xb8] sm:$0xff]  }
 0x1ff   : > { %4354 = vmatmul.mubr.bf16.vlgmr.msra.gmra.mrb[20].mxu1 %v2039_v34  ;;  %3199 = vperm.xlu1 %4682, %v2376_v50   ;;  %v2535_v30 = vor.u32 %v2533_v19, %v2531_v5  ;;  %v2987_v34 = vshll.u32 %v5711_v14, 16  ;;  %v2075_v32 = vsel %vm1571_vm6, %v2065_v0, %v2074_v25  ;;  %v2084_v5 = vsel %vm1571_vm6, %v2074_v25, %v2083_v28  ;;  %v5759_v0 = vld [vmem:[#allocation8 + $0x230] sm:$0xff]  }
 0x200   : > { %4357 = vmatprep.mubr.bf16.mxu1 %v2048_v44  ;;  %4473 = vmatpush3.bf16.msra.mxu1 %v5642_v15  ;;  %v2548_v35 = vsel %vm2488_vm7, %v5723_v21, %v2547_v38  ;;  %v2551_v50 = vor.u32 %v2549_v23, %v2547_v38  ;;  %v3003_v19 = vshll.u32 %v4821_v49, 16  ;;  %v2093_v7 = vsel %vm1571_vm6, %v2083_v28, %v2092_v61 }
 0x201   : > { %4404 = vmatpush3.bf16.msra.mxu0 %v4799_v16  ;;  %4466 = vmatprep.subr.bf16.mxu1 %v5663_v48  ;;  %v4813_v16 = vld [vmem:[#allocation2 + $0x4c] ss:$0 sps:$4 sm:$0x11]   ;;  %v5728_v40 = vsel %vm2488_vm7, %v2535_v30, %v2539_v53  ;;  %v5747_v52 = vrot.slane %v2987_v34, 1  ;;  %v3007_v14 = vshrl.u32 %v4821_v49, 16  ;;  %v3019_v25 = vshll.u32 %v4823_v11, 16 }
 0x202   : > { %4405 = vmatprep.subr.bf16.mxu0 %v4802_v4  ;;  %v2553_v44 = vshll.u32 %v4813_v16, 16  ;;  %3214 = vperm.xlu0 %4681, %v2379_v22   ;;  %v3005_v30 = vrot.slane %v3003_v19, 1  ;;  %v2390_v34 = vld [vmem:[%s6064_s19 + $0x78] sm:$0xff] }
 0x203   : > { %3209 = vperm.xlu1 %4682, %v2378_v8   ;;  %v2993_v62 = vor.u32 %v2991_v26, %v5747_v52  ;;  %v2999_v8 = vshrl.u32 %v5730_v31, 16  ;;  %v3021_v31 = vrot.slane %v3019_v25, 1 }
 0x204   : > { %4390 = vmatmul.mubr.bf16.gmra.mrb[20].mxu0 %v5689_v55  ;;  %4474 = vmatpush3.bf16.msra.mxu1 %v5663_v48  ;;  %v2555_v29 = vrot.slane %v2553_v44, 1  ;;  %v3009_v38 = vor.u32 %v3007_v14, %v3005_v30 }
 0x205   : > { %4393 = vmatprep.mubr.bf16.mxu0 %v5694_v36  ;;  %4406 = vmatpush3.bf16.msra.mxu0 %v4802_v4  ;;  %v2723_v4 = vrot.slane %v2721_v12, 1  ;;  %v3001_v16 = vor.u32 %v2999_v8, %v2997_v2 }
 0x206   : > { %4467 = vmatprep.subr.bf16.mxu1 %v5683_v58  ;;  %4407 = vmatprep.subr.bf16.mxu0 %v4805_v60  ;;  %v2556_v18 = vsel %vm2488_vm7, %v2551_v50, %v2555_v29 }
 0x207   : > { %4358 = vmatmul.mubr.bf16.gmra.mrb[24].mxu1 %v2057_v6  ;;  %3219 = vperm.xlu1 %4682, %v2380_v33   ;;  %v2724_v56 = vor.u32 %v2723_v4, %v2719_v42  ;;  %v4822_v6 = vld [vmem:[#allocation2 + $0x4c] sm:$0xff]   ;;  %v3006_v20 = vsel %vm2488_vm7, %v3001_v16, %v3005_v30  ;;  %v4826_v33 = vld [vmem:[#allocation2 + $0x1c] sm:$0xff]  }
 0x208   : > { %4361 = vmatprep.mubr.bf16.mxu1 %v2066_v37  ;;  %4475 = vmatpush3.bf16.msra.mxu1 %v5683_v58  ;;  %v2998_v37 = vsel %vm2488_vm7, %v2993_v62, %v2997_v2  ;;  %v3011_v47 = vshll.u32 %v4822_v6, 16  ;;  %v3015_v28 = vshrl.u32 %v4822_v6, 16  ;;  %v2389_v4 = vld [vmem:[%s6064_s19 + $0x70] sm:$0xff]  ;;  %v2967_v49 = vshrl.u32 %v4826_v33, 16 }
 0x209   : > { %4408 = vmatpush3.bf16.msra.mxu0 %v4805_v60  ;;  %4468 = vmatprep.subr.bf16.mxu1 %v5705_v43  ;;  %v2382_v60 = vld [vmem:[%s6064_s19 + $0x38] sm:$0xff]  ;;  %v2725_v53 = vsel %vm2488_vm7, %v2724_v56, %v5587_v63  ;;  %v2384_v63 = vld [vmem:[%s6064_s19 + $0x48] sm:$0xff] }
 0x20a   : > { %4409 = vmatprep.subr.bf16.mxu0 %v4808_v59  ;;  %v3013_v12 = vrot.slane %v3011_v47, 1 }
 0x20b   : > { %3229 = vperm.xlu1 %4682, %v2382_v60  }
 0x20c   : > { %4394 = vmatmul.mubr.bf16.gmra.mrb[24].mxu0 %v5728_v40  ;;  %4476 = vmatpush3.bf16.msra.mxu1 %v5705_v43 }
 0x20d   : > { %4397 = vmatprep.mubr.bf16.mxu0 %v2548_v35  ;;  %4410 = vmatpush3.bf16.msra.mxu0 %v4808_v59  ;;  %v2381_v59 = vld [vmem:[%s6064_s19 + $0x30] sm:$0xff] }
 0x20e   : > { %4469 = vmatprep.subr.bf16.mxu1 %v5725_v10  ;;  %4411 = vmatprep.subr.bf16.mxu0 %v4811_v27  ;;  %v4825_v35 = vld [vmem:[#allocation2 + $0x14] sm:$0xff]  }
 0x20f   : > { %4362 = vmatmul.mubr.bf16.gmra.mrb[28].mxu1 %v2075_v32  ;;  %3224 = vperm.xlu0 %4681, %v2381_v59   ;;  %v2958_v23 = vshll.u32 %v4825_v35, 16  ;;  %v4827_v32 = vld [vmem:[#allocation2 + $0x24] sm:$0xff]  }
 0x210   : > { %4365 = vmatprep.mubr.bf16.mxu1 %v2084_v5  ;;  %4477 = vmatpush3.bf16.msra.mxu1 %v5725_v10  ;;  %v2971_v45 = vshll.u32 %v4827_v32, 16  ;;  %v2975_v54 = vshrl.u32 %v4827_v32, 16 }
 0x211   : > { %4412 = vmatpush3.bf16.msra.mxu0 %v4811_v27  ;;  %4470 = vmatprep.subr.bf16.mxu1 %v5740_v57  ;;  %v3014_v27 = vsel %vm2488_vm7, %v3009_v38, %v3013_v12  ;;  %v2960_v44 = vrot.slane %v2958_v23, 1 }
 0x212   : > { %4413 = vmatprep.subr.bf16.mxu0 %v4814_v41  ;;  %3239 = vperm.xlu1 %4682, %v2384_v63  }
 0x213   : > { %3234 = vperm.xlu0 %4681, %v2383_v3  }
 0x214   : > { %4398 = vmatmul.mubr.bf16.gmra.mrb[28].mxu0 %v2556_v18  ;;  %4478 = vmatpush3.bf16.msra.mxu1 %v5740_v57 }
 0x215   : > { %4414 = vmatpush3.bf16.msra.mxu0 %v4814_v41  ;;  %4417 = vmatprep.mubr.bf16.mxu0 %v2725_v53  ;;  %v2956_v41 = vshrl.u32 %v4825_v35, 16 }
 0x216   : > { %4471 = vmatprep.subr.bf16.mxu1 %v5759_v0  ;;  %4415 = vmatprep.subr.bf16.mxu0 %v4817_v46 }
 0x217   : > { %4366 = vmatmul.mubr.bf16.gmra.mrb[32].mxu1 %v2093_v7  ;;  %3249 = vperm.xlu1 %4682, %v2386_v13   ;;  %v2961_v42 = vor.u32 %v2960_v44, %v2956_v41 }
 0x218   : > { %4479 = vmatpush3.bf16.msra.mxu1 %v5759_v0  ;;  %4457 = vmatprep.mubr.bf16.mxu1 %v2998_v37 }
 0x219   : > { %4416 = vmatpush3.bf16.msra.mxu0 %v4817_v46  ;;  %4472 = vmatprep.subr.bf16.mxu1 %v5769_v1 }
 0x21a   : > { %4433 = vmatprep.subr.bf16.mxu0 %v5642_v15  ;;  %3244 = vperm.xlu0 %4681, %v2385_v17  }
 0x21c   : > { %4418 = vmatmul.mubr.bf16.vlgmr.msra.gmra.mrb[16].mxu0 %v5615_v51  ;;  %4480 = vmatpush3.bf16.msra.mxu1 %v5769_v1  ;;  %v2388_v51 = vld [vmem:[%s6064_s19 + $0x68] sm:$0xff] }
 0x21d   : > { %4421 = vmatprep.mubr.bf16.mxu0 %v5646_v24  ;;  %4434 = vmatpush3.bf16.msra.mxu0 %v5642_v15  ;;  %v2387_v15 = vld [vmem:[%s6064_s19 + $0x60] sm:$0xff]  ;;  %v3017_v24 = vor.u32 %v3015_v28, %v3013_v12 }
 0x21e   : > { %4435 = vmatprep.subr.bf16.mxu0 %v5663_v48  ;;  %3259 = vperm.xlu1 %4682, %v2388_v51  }
 0x21f   : > { %4458 = vmatmul.mubr.bf16.vlgmr.msra.gmra.mrb[36].mxu1 %v3006_v20  ;;  %3254 = vperm.xlu0 %4681, %v2387_v15  }
 0x220   : > { %4461 = vmatprep.mubr.bf16.mxu1 %v3014_v27 }
 0x221   : > { %4436 = vmatpush3.bf16.msra.mxu0 %v5663_v48  ;;  %v3022_v48 = vsel %vm2488_vm7, %v3017_v24, %v3021_v31 }
 0x222   : > { %4437 = vmatprep.subr.bf16.mxu0 %v5683_v58  ;;  %3269 = vperm.xlu1 %4682, %v2390_v34  }
 0x223   : > { %3264 = vperm.xlu0 %4681, %v2389_v4  }
 0x224   : > { %4422 = vmatmul.mubr.bf16.gmra.mrb[20].mxu0 %v5650_v9  ;;  %v4824_v9 = vld [vmem:[#allocation2 + $0x44] ss:$0 sps:$4 sm:$0x11]  }
 0x225   : > { %4425 = vmatprep.mubr.bf16.mxu0 %v5689_v55  ;;  %4438 = vmatpush3.bf16.msra.mxu0 %v5683_v58  ;;  %v2963_v55 = vshll.u32 %v4826_v33, 16  ;;  %v2727_v58 = vshll.u32 %v4824_v9, 16 }
 0x226   : > { %4439 = vmatprep.subr.bf16.mxu0 %v5705_v43 }
 0x227   : > { %4462 = vmatmul.mubr.bf16.gmra.mrb[40].mxu1 %v3022_v48  ;;  %v2965_v39 = vrot.slane %v2963_v55, 1  ;;  %v2729_v5 = vrot.slane %v2727_v58, 1 }
 0x229   : > { %4440 = vmatpush3.bf16.msra.mxu0 %v5705_v43  ;;  %v4828_v43 = vld [vmem:[#allocation2 + $0x2c] sm:$0xff]   ;;  %v2969_v56 = vor.u32 %v2967_v49, %v2965_v39 }
 0x22a   : > { %4441 = vmatprep.subr.bf16.mxu0 %v5725_v10  ;;  %v2979_v50 = vshll.u32 %v4828_v43, 16  ;;  %v2983_v29 = vshrl.u32 %v4828_v43, 16 }
 0x22c   : > { %4426 = vmatmul.mubr.bf16.gmra.mrb[24].mxu0 %v5694_v36  ;;  %v2730_v36 = vsel %vm2488_vm7, %v5723_v21, %v2729_v5 }
 0x22d   : > { %4429 = vmatprep.mubr.bf16.mxu0 %v5728_v40  ;;  %4442 = vmatpush3.bf16.msra.mxu0 %v5725_v10  ;;  %v2966_v40 = vsel %vm2488_vm7, %v2961_v42, %v2965_v39  ;;  %v2973_v10 = vrot.slane %v2971_v45, 1 }
 0x22e   : > { %4443 = vmatprep.subr.bf16.mxu0 %v5740_v57 }
 0x22f   : > { %v2977_v22 = vor.u32 %v2975_v54, %v2973_v10  ;;  %v2974_v60 = vsel %vm2488_vm7, %v2969_v56, %v2973_v10 }
 0x231   : > { %4444 = vmatpush3.bf16.msra.mxu0 %v5740_v57  ;;  %v2981_v57 = vrot.slane %v2979_v50, 1 }
 0x232   : > { %4445 = vmatprep.subr.bf16.mxu0 %v5759_v0 }
 0x233   : > { %v2982_v21 = vsel %vm2488_vm7, %v2977_v22, %v2981_v57  ;;  %v2985_v26 = vor.u32 %v2983_v29, %v2981_v57 }
 0x234   : > { %4430 = vmatmul.mubr.bf16.gmra.mrb[28].mxu0 %v2730_v36 }
 0x235   : > { %4446 = vmatpush3.bf16.msra.mxu0 %v5759_v0  ;;  %4449 = vmatprep.mubr.bf16.mxu0 %v2966_v40  ;;  %v2990_v61 = vsel %vm2488_vm7, %v2985_v26, %v5747_v52 }
 0x236   : > { %4447 = vmatprep.subr.bf16.mxu0 %v5769_v1 }
 0x239   : > { %4448 = vmatpush3.bf16.msra.mxu0 %v5769_v1 }
 0x23c   : > { %4450 = vmatmul.mubr.bf16.vlgmr.msra.gmra.mrb[16].mxu0 %v2974_v60 }
 0x23d   : > { %4453 = vmatprep.mubr.bf16.mxu0 %v2982_v21 }
 0x244   : > { %4454 = vmatmul.mubr.bf16.gmra.mrb[20].mxu0 %v2990_v61 }
 0x249   : > { %v2266_v0 = vpop.permute.xlu0 %2265 }
 0x24d   : > { %v2271_v6 = vpop.permute.xlu0 %2270 }
 0x251   : > { %v2286_v30 = vpop.permute.xlu0 %2285 }
 0x255   : > { %v2276_v62 = vpop.permute.xlu1 %2275 }
 0x256   : > { %v2296_v14 = vpop.permute.xlu0 %2295 }
 0x259   : > { %v2281_v53 = vpop.permute.xlu1 %2280 }
 0x25a   : > { %v2306_v38 = vpop.permute.xlu0 %2305 }
 0x25e   : > { %v2291_v47 = vpop.permute.xlu1 %2290 }
 0x261   : > { %v2316_v25 = vpop.permute.xlu0 %2315 }
 0x262   : > { %v2301_v11 = vpop.permute.xlu1 %2300 }
 0x266   : > { %v2311_v16 = vpop.permute.xlu1 %2310 }
 0x269   : > { %v2326_v28 = vpop.permute.xlu0 %2325 }
 0x26e   : > { %v2336_v32 = vpop.permute.xlu0 %2335 }
 0x271   : > { %v2321_v27 = vpop.permute.xlu1 %2320 }
 0x272   : > { %v5846_v54 = vpop.permute.xlu0 %3194 }
 0x276   : > { %v2331_v35 = vpop.permute.xlu1 %2330 }
 0x279   : > { %v5854_v61 = vpop.permute.xlu0 %3204 }
 0x27a   : > { %v2341_v41 = vpop.permute.xlu1 %2340 }
 0x27e   : > { %v5852_v57 = vpop.permute.xlu1 %3199 }
 0x2af   : > { %v4259_v46 = vpop.f32.mrb[0].mxu0 }
 0x2b0   : > { %v1430_v18 = vpop.f32.mrb[1].mxu0 }
 0x2b1   : > { %v4260_v2 = vpop.f32.mrb[2].mxu0 }
 0x2b2   : > { %v1433_v19 = vpop.f32.mrb[3].mxu0 }
 0x2b7   : > { %v4263_v59 = vpop.f32.mrb[4].mxu0 }
 0x2b8   : > { %v1446_v1 = vpop.f32.mrb[5].mxu0 }
 0x2b9   : > { %v4264_v7 = vpop.f32.mrb[6].mxu0 }
 0x2ba   : > { %v1449_v37 = vpop.f32.mrb[7].mxu0 }
 0x2bf   : > { %v4267_v63 = vpop.f32.mrb[8].mxu0 }
 0x2c0   : > { %v1462_v3 = vpop.f32.mrb[9].mxu0 }
 0x2c1   : > { %v4268_v8 = vpop.f32.mrb[10].mxu0 }
 0x2c2   : > { %v1465_v52 = vpop.f32.mrb[11].mxu0 }
 0x2c7   : > { %v4271_v12 = vpop.f32.mrb[12].mxu0 }
 0x2c8   : > { %v1478_v13 = vpop.f32.mrb[13].mxu0 }
 0x2c9   : > { %v4272_v17 = vpop.f32.mrb[14].mxu0 }
 0x2ca   : > { %v1481_v20 = vpop.f32.mrb[15].mxu0 }
 0x2d2   : > { %v4355_v51 = vpop.f32.mrb[20].mxu1 }
 0x2d3   : > { %v2345_v15 = vmul.f32 %v4355_v51, %v2276_v62  ;;  %v2184_v24 = vpop.f32.mrb[21].mxu1 }
 0x2d4   : > { %v2343_v31 = vmul.f32 %v2266_v0, %v2184_v24  ;;  %v4356_v34 = vpop.f32.mrb[22].mxu1 }
 0x2d5   : > { %v5834_v4 = vadd.f32 %v4259_v46, %v2345_v15  ;;  %v2346_v48 = vmul.f32 %v4356_v34, %v2281_v53  ;;  %v2187_v33 = vpop.f32.mrb[23].mxu1 }
 0x2d6   : > { %v5836_v23 = vadd.f32 %v2343_v31, %v1430_v18  ;;  %v2344_v9 = vmul.f32 %v2271_v6, %v2187_v33 }
 0x2d7   : > { %v5838_v44 = vadd.f32 %v4260_v2, %v2346_v48 }
 0x2d8   : > { %v5840_v55 = vadd.f32 %v2344_v9, %v1433_v19  ;;  %v5856_v19 = vpop.permute.xlu1 %3209 }
 0x2da   : > { %v4359_v58 = vpop.f32.mrb[24].mxu1 }
 0x2db   : > { %v2349_v42 = vmul.f32 %v4359_v58, %v2296_v14  ;;  %v2200_v39 = vpop.f32.mrb[25].mxu1 }
 0x2dc   : > { %v2347_v45 = vmul.f32 %v2286_v30, %v2200_v39  ;;  %v4360_v43 = vpop.f32.mrb[26].mxu1  ;;  %v5860_v14 = vpop.permute.xlu1 %3219 }
 0x2dd   : > { %v5842_v5 = vadd.f32 %v4263_v59, %v2349_v42  ;;  %v2350_v36 = vmul.f32 %v4360_v43, %v2301_v11  ;;  %v2203_v40 = vpop.f32.mrb[27].mxu1 }
 0x2de   : > { %v5844_v10 = vadd.f32 %v2347_v45, %v1446_v1  ;;  %v2348_v50 = vmul.f32 %v2291_v47, %v2203_v40  ;;  %v5858_v1 = vpop.permute.xlu0 %3214 }
 0x2df   : > { %v5848_v49 = vadd.f32 %v4264_v7, %v2350_v36  ;;  %v5877_v36 = vld [vmem:[%s6065_s17] ss:$0 sm:$0xff] }
 0x2e0   : > { %v5850_v22 = vadd.f32 %v2348_v50, %v1449_v37  ;;  %v5872_v51 = vpop.permute.xlu1 %3229 }
 0x2e2   : > { %v4363_v56 = vpop.f32.mrb[28].mxu1 }
 0x2e3   : > { %v2353_v60 = vmul.f32 %v4363_v56, %v2316_v25  ;;  %v2216_v21 = vpop.f32.mrb[29].mxu1 }
 0x2e4   : > { %v2351_v29 = vmul.f32 %v2306_v38, %v2216_v21  ;;  %v4364_v26 = vpop.f32.mrb[30].mxu1  ;;  %v5880_v21 = vld [vmem:[%s5325_s24] sm:$0xff]  }
 0x2e5   : > { %v2369_v0 = vadd.f32 %v4267_v63, %v2353_v60  ;;  %v2354_v46 = vmul.f32 %v4364_v26, %v2321_v27  ;;  %v2219_v18 = vpop.f32.mrb[31].mxu1  ;;  %v3360_v26 = vunpack.c.h.bf16 %v5880_v21 }
 0x2e6   : > { %v2367_v62 = vadd.f32 %v2351_v29, %v1462_v3  ;;  %v2352_v2 = vmul.f32 %v2311_v16, %v2219_v18  ;;  %v3359_v29 = vunpack.c.l.bf16 %v5880_v21 }
 0x2e7   : > { %v2370_v6 = vadd.f32 %v4268_v8, %v2354_v46 }
 0x2e8   : > { %v2368_v53 = vadd.f32 %v2352_v2, %v1465_v52  ;;  %v5870_v52 = vpop.permute.xlu0 %3224 }
 0x2ea   : > { %v4367_v59 = vpop.f32.mrb[32].mxu1 }
 0x2eb   : > { %v2357_v7 = vmul.f32 %v4367_v59, %v2336_v32  ;;  %v2232_v37 = vpop.f32.mrb[33].mxu1  ;;  %v4838_v59 = vld [vmem:[%s5325_s24 + $0x20] sm:$0xff]  }
 0x2ec   : > { %v2355_v30 = vmul.f32 %v2326_v28, %v2232_v37  ;;  %v4368_v47 = vpop.f32.mrb[34].mxu1  ;;  %v3235_v31 = vpop.permute.xlu0 %3234  ;;  %v3368_v37 = vunpack.c.h.bf16 %v4838_v59 }
 0x2ed   : > { %v5862_v11 = vadd.f32 %v4271_v12, %v2357_v7  ;;  %v2358_v63 = vmul.f32 %v4368_v47, %v2341_v41  ;;  %v2235_v38 = vpop.f32.mrb[35].mxu1  ;;  %v3240_v12 = vpop.permute.xlu1 %3239  ;;  %v3367_v7 = vunpack.c.l.bf16 %v4838_v59 }
 0x2ee   : > { %v5864_v25 = vadd.f32 %v2355_v30, %v1478_v13  ;;  %v2356_v3 = vmul.f32 %v2331_v35, %v2235_v38 }
 0x2ef   : > { %v5866_v16 = vadd.f32 %v4272_v17, %v2358_v63  ;;  %v4839_v63 = vld [vmem:[%s5325_s24 + $0x28] sm:$0xff]  }
 0x2f0   : > { %v5868_v8 = vadd.f32 %v2356_v3, %v1481_v20  ;;  %v3245_v13 = vpop.permute.xlu0 %3244  ;;  %v3369_v38 = vunpack.c.l.bf16 %v4839_v63 }
 0x2f1   : > { %v3250_v17 = vpop.permute.xlu1 %3249 }
 0x2f2   : > { %v4459_v27 = vpop.f32.mrb[36].mxu1 }
 0x2f3   : > { %v3145_v28 = vpop.f32.mrb[37].mxu1 }
 0x2f4   : > { %v4460_v15 = vpop.f32.mrb[38].mxu1  ;;  %v3255_v43 = vpop.permute.xlu0 %3254 }
 0x2f5   : > { %v3148_v24 = vpop.f32.mrb[39].mxu1  ;;  %v3260_v46 = vpop.permute.xlu1 %3259 }
 0x2fa   : > { %v4463_v34 = vpop.f32.mrb[40].mxu1 }
 0x2fb   : > { %v3161_v48 = vpop.f32.mrb[41].mxu1 }
 0x2fc   : > { %v4464_v33 = vpop.f32.mrb[42].mxu1 }
 0x2fd   : > { %v3164_v9 = vpop.f32.mrb[43].mxu1 }
 0x2ff   : > { %v4427_v35 = vpop.f32.mrb[24].mxu0 }
 0x300   : > { %v4481_v20 = vadd.f32 %v4459_v27, %v4427_v35  ;;  %v2847_v32 = vpop.f32.mrb[25].mxu0  ;;  %v3265_v35 = vpop.permute.xlu0 %3264 }
 0x301   : > { %v4482_v58 = vadd.f32 %v3145_v28, %v2847_v32  ;;  %v4428_v41 = vpop.f32.mrb[26].mxu0 }
 0x302   : > { %v3282_v42 = vmul.f32 %v4481_v20, %v3245_v13  ;;  %v4483_v39 = vadd.f32 %v4460_v15, %v4428_v41  ;;  %v2850_v45 = vpop.f32.mrb[27].mxu0  ;;  %v5889_v15 = vld [vmem:[%s5325_s24 + $0x30] sm:$0xff]  }
 0x303   : > { %v3280_v40 = vmul.f32 %v4482_v58, %v3235_v31  ;;  %v4484_v50 = vadd.f32 %v3148_v24, %v2850_v45  ;;  %v3371_v24 = vunpack.c.l.bf16 %v5889_v15 }
 0x304   : > { %v3298_v56 = vadd.f32 %v3282_v42, %v2369_v0  ;;  %v3283_v60 = vmul.f32 %v4483_v39, %v3250_v17  ;;  %v3370_v0 = vunpack.c.h.bf16 %v4839_v63  ;;  %v3372_v17 = vunpack.c.h.bf16 %v5889_v15 }
 0x305   : > { %v3296_v18 = vadd.f32 %v3280_v40, %v2367_v62  ;;  %v3281_v2 = vmul.f32 %v4484_v50, %v3240_v12  ;;  %v3270_v40 = vpop.permute.xlu1 %3269 }
 0x306   : > { %v3321_v30 = vadd.f32 %v5877_v36, %v3298_v56  ;;  %v3299_v47 = vadd.f32 %v3283_v60, %v2370_v6 }
 0x307   : > { %v3319_v3 = vadd.f32 %v5877_v36, %v3296_v18  ;;  %v3297_v27 = vadd.f32 %v3281_v2, %v2368_v53  ;;  %v4431_v28 = vpop.f32.mrb[28].mxu0 }
 0x308   : > { %v3337_v31 = vmax.f32 %v3321_v30, 0.0  ;;  %v3322_v62 = vadd.f32 %v5877_v36, %v3299_v47  ;;  %v4485_v12 = vadd.f32 %v4463_v34, %v4431_v28  ;;  %v2863_v13 = vpop.f32.mrb[29].mxu0 }
 0x309   : > { %v3335_v6 = vmax.f32 %v3319_v3, 0.0  ;;  %v3320_v20 = vadd.f32 %v5877_v36, %v3297_v27  ;;  %v4486_v32 = vadd.f32 %v3161_v48, %v2863_v13  ;;  %v4432_v58 = vpop.f32.mrb[30].mxu0  ;;  %v4841_v27 = vld [vmem:[%s5325_s24 + $0x38] sm:$0xff]  }
 0x30a   : > { %v3353_v53 = vmin.f32 %v3337_v31, 6.0  ;;  %v3338_v41 = vmax.f32 %v3322_v62, 0.0  ;;  %v3286_v42 = vmul.f32 %v4485_v12, %v3265_v35  ;;  %v4487_v39 = vadd.f32 %v4464_v33, %v4432_v58  ;;  %v2866_v45 = vpop.f32.mrb[31].mxu0 }
 0x30b   : > { %v3351_v50 = vmin.f32 %v3335_v6, 6.0  ;;  %v3336_v56 = vmax.f32 %v3320_v20, 0.0  ;;  %v3284_v34 = vmul.f32 %v4486_v32, %v3255_v43  ;;  %v4488_v60 = vadd.f32 %v3164_v9, %v2866_v45 }
 0x30c   : > { %v3385_v18 = vadd.f32 %v3369_v38, %v3353_v53  ;;  %v3354_v2 = vmin.f32 %v3338_v41, 6.0  ;;  %v3302_v59 = vadd.f32 %v3286_v42, %v5862_v11  ;;  %v3287_v30 = vmul.f32 %v4487_v39, %v3270_v40 }
 0x30d   : > { %v3383_v47 = vadd.f32 %v3367_v7, %v3351_v50  ;;  %v3352_v48 = vmin.f32 %v3336_v56, 6.0  ;;  %v3300_v63 = vadd.f32 %v3284_v34, %v5864_v25  ;;  %v3285_v3 = vmul.f32 %v4488_v60, %v3260_v46 }
 0x30e   : > { %v3373_v33 = vunpack.c.l.bf16 %v4841_v27  ;;  %v3386_v28 = vadd.f32 %v3370_v0, %v3354_v2  ;;  %v3325_v31 = vadd.f32 %v5877_v36, %v3302_v59  ;;  %v3303_v62 = vadd.f32 %v3287_v30, %v5866_v16 }
 0x30f   : > { %v3374_v43 = vunpack.c.h.bf16 %v4841_v27  ;;  %v3384_v9 = vadd.f32 %v3368_v37, %v3352_v48  ;;  %v3323_v38 = vadd.f32 %v5877_v36, %v3300_v63  ;;  %v3301_v12 = vadd.f32 %v3285_v3, %v5868_v8  ;;  %v4451_v11 = vpop.f32.mrb[16].mxu0 }
 0x310   : > { %v3928_v13 = vpack.c.bf16 %v3386_v28, %v3385_v18  ;;  %v3341_v7 = vmax.f32 %v3325_v31, 0.0  ;;  %v3326_v35 = vadd.f32 %v5877_v36, %v3303_v62  ;;  %v3274_v25 = vmul.f32 %v4451_v11, %v5854_v61  ;;  %v3113_v46 = vpop.f32.mrb[17].mxu0  ;;  %v4842_v18 = vld [vmem:[%s5325_s24 + $0x8] sm:$0xff]  }
 0x311   : > { %v3923_v6 = vpack.c.bf16 %v3384_v9, %v3383_v47  ;;  %v3339_v0 = vmax.f32 %v3323_v38, 0.0  ;;  %v3324_v20 = vadd.f32 %v5877_v36, %v3301_v12  ;;  %v3272_v16 = vmul.f32 %v5846_v54, %v3113_v46  ;;  %v4452_v32 = vpop.f32.mrb[18].mxu0 }
 0x312   : > { %3952 = vst [vmem:[%s5907_s15 + $0x28] sm:$0xff] %v3928_v13   ;;  %v3357_v8 = vmin.f32 %v3341_v7, 6.0  ;;  %v3342_v37 = vmax.f32 %v3326_v35, 0.0  ;;  %v3290_v58 = vadd.f32 %v3274_v25, %v5834_v4  ;;  %v3275_v61 = vmul.f32 %v4452_v32, %v5856_v19  ;;  %v3116_v53 = vpop.f32.mrb[19].mxu0 }
 0x313   : > { %3951 = vst [vmem:[%s5907_s15 + $0x20] sm:$0xff] %v3923_v6   ;;  %v3355_v41 = vmin.f32 %v3339_v0, 6.0  ;;  %v3340_v42 = vmax.f32 %v3324_v20, 0.0  ;;  %v3288_v39 = vadd.f32 %v3272_v16, %v5836_v23  ;;  %v3273_v54 = vmul.f32 %v5852_v57, %v3116_v53  ;;  %v4844_v16 = vld [vmem:[%s5325_s24 + $0x10] sm:$0xff]  }
 0x314   : > { %v3389_v45 = vadd.f32 %v3373_v33, %v3357_v8  ;;  %v3358_v40 = vmin.f32 %v3342_v37, 6.0  ;;  %v3313_v50 = vadd.f32 %v5877_v36, %v3290_v58  ;;  %v3291_v56 = vadd.f32 %v3275_v61, %v5838_v44 }
 0x315   : > { %v3387_v4 = vadd.f32 %v3371_v24, %v3355_v41  ;;  %v3356_v34 = vmin.f32 %v3340_v42, 6.0  ;;  %v3311_v19 = vadd.f32 %v5877_v36, %v3288_v39  ;;  %v3289_v60 = vadd.f32 %v3273_v54, %v5840_v55 }
 0x316   : > { %v3361_v2 = vunpack.c.l.bf16 %v4842_v18  ;;  %v3390_v59 = vadd.f32 %v3374_v43, %v3358_v40  ;;  %v3329_v23 = vmax.f32 %v3313_v50, 0.0  ;;  %v3314_v57 = vadd.f32 %v5877_v36, %v3291_v56 }
 0x317   : > { %v3362_v30 = vunpack.c.h.bf16 %v4842_v18  ;;  %v3388_v47 = vadd.f32 %v3372_v17, %v3356_v34  ;;  %v3327_v44 = vmax.f32 %v3311_v19, 0.0  ;;  %v3312_v48 = vadd.f32 %v5877_v36, %v3289_v60  ;;  %v4455_v24 = vpop.f32.mrb[20].mxu0 }
 0x318   : > { %v3938_v63 = vpack.c.bf16 %v3390_v59, %v3389_v45  ;;  %v3345_v3 = vmin.f32 %v3329_v23, 6.0  ;;  %v3330_v27 = vmax.f32 %v3314_v57, 0.0  ;;  %v3278_v55 = vmul.f32 %v4455_v24, %v5870_v52  ;;  %v3129_v33 = vpop.f32.mrb[21].mxu0 }
 0x319   : > { %v3933_v28 = vpack.c.bf16 %v3388_v47, %v3387_v4  ;;  %v3343_v31 = vmin.f32 %v3327_v44, 6.0  ;;  %v3328_v62 = vmax.f32 %v3312_v48, 0.0  ;;  %v3276_v43 = vmul.f32 %v5858_v1, %v3129_v33  ;;  %v4456_v9 = vpop.f32.mrb[22].mxu0 }
 0x31a   : > { %3954 = vst [vmem:[%s5907_s15 + $0x38] sm:$0xff] %v3938_v63   ;;  %v3377_v15 = vadd.f32 %v3361_v2, %v3345_v3  ;;  %v3346_v17 = vmin.f32 %v3330_v27, 6.0  ;;  %v3294_v38 = vadd.f32 %v3278_v55, %v5842_v5  ;;  %v3279_v12 = vmul.f32 %v4456_v9, %v5872_v51  ;;  %v3132_v11 = vpop.f32.mrb[23].mxu0 }
 0x31b   : > { %3953 = vst [vmem:[%s5907_s15 + $0x30] sm:$0xff] %v3933_v28   ;;  %v3375_v52 = vadd.f32 %v3359_v29, %v3343_v31  ;;  %v3344_v13 = vmin.f32 %v3328_v62, 6.0  ;;  %v3292_v7 = vadd.f32 %v3276_v43, %v5844_v10  ;;  %v3277_v1 = vmul.f32 %v5860_v14, %v3132_v11  ;;  %v4843_v29 = vld [vmem:[%s5325_s24 + $0x18] sm:$0xff]   ;;  %s3821_s24 = sshll.u32 %s3484_s14, 6 }
 0x31c   : > { %v3378_v35 = vadd.f32 %v3362_v30, %v3346_v17  ;;  %v3317_v25 = vadd.f32 %v5877_v36, %v3294_v38  ;;  %v3295_v46 = vadd.f32 %v3279_v12, %v5848_v49  ;;  %v3365_v10 = vunpack.c.l.bf16 %v4843_v29  ;;  %s5954_s5 = scalar_lea.hbm %s6067_s6, %s3821_s24 }
 0x31d   : > { %v3376_v5 = vadd.f32 %v3360_v26, %v3344_v13  ;;  %v3315_v51 = vadd.f32 %v5877_v36, %v3292_v7  ;;  %v3293_v6 = vadd.f32 %v3277_v1, %v5850_v22  ;;  %v3363_v32 = vunpack.c.l.bf16 %v4844_v16 }
 0x31e   : > { %v3908_v0 = vpack.c.bf16 %v3378_v35, %v3377_v15  ;;  %v3333_v14 = vmax.f32 %v3317_v25, 0.0  ;;  %v3318_v20 = vadd.f32 %v5877_v36, %v3295_v46  ;;  %v3366_v26 = vunpack.c.h.bf16 %v4843_v29 }
 0x31f   : > { %v3903_v49 = vpack.c.bf16 %v3376_v5, %v3375_v52  ;;  %v3331_v8 = vmax.f32 %v3315_v51, 0.0  ;;  %v3316_v21 = vadd.f32 %v5877_v36, %v3293_v6  ;;  %v3364_v58 = vunpack.c.h.bf16 %v4844_v16 }
 0x320   : > { %3948 = vst [vmem:[%s5907_s15 + $0x8] sm:$0xff] %v3908_v0   ;;  %v3349_v37 = vmin.f32 %v3333_v14, 6.0  ;;  %v3334_v22 = vmax.f32 %v3318_v20, 0.0 }
 0x321   : > { %3904 = vst [vmem:[%s5907_s15] sm:$0xff] %v3903_v49   ;;  %v3347_v61 = vmin.f32 %v3331_v8, 6.0  ;;  %v3332_v53 = vmax.f32 %v3316_v21, 0.0 }
 0x322   : > { %v3381_v41 = vadd.f32 %v3365_v10, %v3349_v37  ;;  %v3350_v42 = vmin.f32 %v3334_v22, 6.0 }
 0x323   : > { %v3379_v39 = vadd.f32 %v3363_v32, %v3347_v61  ;;  %v3348_v54 = vmin.f32 %v3332_v53, 6.0 }
 0x324   : > { %v3382_v36 = vadd.f32 %v3366_v26, %v3350_v42 }
 0x325   : > { %v3380_v45 = vadd.f32 %v3364_v58, %v3348_v54 }
 0x326   : > { %v3918_v40 = vpack.c.bf16 %v3382_v36, %v3381_v41 }
 0x327   : > { %v3913_v50 = vpack.c.bf16 %v3380_v45, %v3379_v39 }
 0x328   : > { %3950 = vst [vmem:[%s5907_s15 + $0x18] sm:$0xff] %v3918_v40  }
 0x329   : > { %3949 = vst [vmem:[%s5907_s15 + $0x10] sm:$0xff] %v3913_v50  }
 0x32a   : > { %4944 = shalt.err (!%p4941_p5)
}
 0x32b   : > { %s4945_s18 = scalar_lea.hbm %s5954_s5, 1024  ;;  %s4949_s15 = scalar_lea.hbm %s6067_s6, 4096 }
 0x32c   : > { %p4946_p9 = scmp.ne.s32.totalorder %s5954_s5, %s4945_s18  ;;  %p4950_p10 = scmp.lt.u32.totalorder %s5954_s5, %s6067_s6 }
 0x32d   : > { %p4951_p6 = scmp.lt.u32.totalorder %s4949_s15, %s4945_s18  ;;  %p4953_p13 = scmp.lt.u32.totalorder %s4945_s18, %s5954_s5 }
 0x32e   : > { %p4947_p0 = pnand %p4946_p9, %p5237_p8 }
 0x32f   : > { %p4952_p11 = por %p4951_p6, %p4950_p10 }
 0x330   : > { %p4948_p4 = pneg %p4947_p0 }
 0x331   : > { %p4954_p3 = por %p4953_p13, %p4952_p11 }
 0x333   : > { %p4955_p7 = pnand %p4954_p3, %p4948_p4 }
 0x335   : > { %4958 = shalt.err (!%p4955_p7)
}
 0x336   : > { %s5042_s24 = smov 64   ;;  %s5043_s23 = smov 4  }
 0x337   : > { %4587 = dma.vmem_to_hbm [thread:$0]  (%p5237_p8), %s5956_s20, 1024, %s5954_s5, %s3472_s30, %s5042_s24, %s5042_s24, %s5043_s23  }
 0x338 PF: > { %s6068_s21 = sld [smem:[#allocation13_spill]]  ;;  %s6069_s7 = sld [smem:[#allocation14_spill]] }
 0x339   : > { %p4609_p12 = scmp.ge.s32.totalorder %s5033_s12, 2 }
 0x33e   : > { %s3502_s4 = sand.u32 1, %s6068_s21   ;;  %p6070_p1 = scmp.ne.s32.totalorder %s6069_s7, 0 }
 0x33f   : > { %s3503_s27 = scalar_lea.sflag [#allocation5], %s3502_s4 }
 0x340   : > { %p4601_p2 = pnand %p4609_p12, %p6070_p1 }
 0x342   : > { %5000 = dma.done.wait (!%p4601_p2), %s3503_s27, 1024  }
 0x343   : > { %5002 = vsyncadd (!%p4601_p2), %s3503_s27, 4294966272  ;;  %s25_s12 = sadd.s32 1, %s5033_s12   ;;  %s6071_s26 = sld [smem:[#allocation15_spill]] }
 0x344   : > { %p22_p5 = scmp.ge.s32.totalorder %s25_s12, 6   ;;  %s6072_s27 = smov %s5009_s28 }
 0x345   : > { %s6073_s28 = smov %s5013_s29  ;;  %s6074_s29 = smov %s5250_s2 }
 0x346   : > { %s6075_s30 = smov %s5025_s10  ;;  %s6076_s9 = smov %s5029_s11 }
 0x347   : > { %s6078_s11 = smov %s6084_s22  ;;  %24 = sbr.rel (!%p22_p5) target bundleno = 15 (0xf), region = 116 }
 0x349   : > { %s6077_s10 = smov %s6071_s26 }
 0x34e   :  { %3508 = vsyncpa [#allocation4], 1 }
 0x34f   :  { %3510 = vsyncpa [#allocation4 + $0x1], 1 }
 0x350   :  { %3511 = vsyncpa [#allocation7], 1 }
 0x351   :  { %3512 = vsyncpa [#allocation5], 1 }
 0x352   :  { %3514 = vsyncpa [#allocation5 + $0x1], 1 }

</bundles_post_ra>
